<compile_context>
chip_gen: v7x
topology: tpu7x:2x2x1
jax: 0.10.0
libtpu: 0.0.40
codegen_flags: <defaults>
</compile_context>

<pallas_src>
import numpy as np
import jax
import jax.numpy as jnp
from jax import lax
from jax.experimental import pallas as pl
from jax.experimental.pallas import tpu as pltpu

# ---------------- static configuration (consistent with the module) -----------
B = 4                    # batch
IN_CH = 6                # in_features
TIME = 30                # time_length (divisible by 10 and 5)
HID = 30                 # GRU hidden units (fixed to 30 in the module)
PAIRS = [(i, j) for i in range(IN_CH) for j in range(i + 1, IN_CH)]
NPAIR = len(PAIRS)                       # 15
CH2 = IN_CH * 4 + NPAIR * 2              # 54 features per window
G3 = 3 * HID                             # stacked gate width (r|z|n) = 90
BT = B * TIME                            # 120
ACT_W = IN_CH + 3 * NPAIR                # 51 activation-slab columns

IDX_I = np.array([i for (i, j) in PAIRS], np.int32)
IDX_J = np.array([j for (i, j) in PAIRS], np.int32)


def _round8(n):
    return ((n + 7) // 8) * 8


# --------------------- constant segment / selection matrices -------------------
def _build_branch_consts(days):
    """Left-multiplying window matrices, output rows indexed (window, batch)."""
    nwin = TIME // days
    rows = nwin * B
    wm = np.zeros((rows, BT), np.float32)      # window mean
    wsum = np.zeros((rows, BT), np.float32)    # window sum (indicator)
    wdec = np.zeros((rows, BT), np.float32)    # decay-linear weights 1..d (normalized)
    wfirst = np.zeros((rows, BT), np.float32)  # pick first element of window
    wlast = np.zeros((rows, BT), np.float32)   # pick last element of window
    scat = np.zeros((BT, rows), np.float32)    # broadcast window stat back over time
    for w in range(nwin):
        for b in range(B):
            r = w * B + b
            base = b * TIME + w * days
            for tl in range(days):
                wm[r, base + tl] = 1.0 / days
                wsum[r, base + tl] = 1.0
                wdec[r, base + tl] = 2.0 * (tl + 1) / (days * (days + 1))
                scat[base + tl, r] = 1.0
            wfirst[r, base] = 1.0
            wlast[r, base + days - 1] = 1.0
    return {"Wm": wm, "Wsum": wsum, "Wdec": wdec, "Wf": wfirst, "Wl": wlast, "S": scat}


CONST_W = 128
CONST_LAYOUT = {}          # (days, name) -> (row offset, rows, cols)
_const_blocks = []
_row = 0
for _d in (10, 5):
    _cb = _build_branch_consts(_d)
    for _name in ("Wm", "Wsum", "Wdec", "Wf", "Wl", "S"):
        _a = _cb[_name]
        CONST_LAYOUT[(_d, _name)] = (_row, _a.shape[0], _a.shape[1])
        _rpad = _round8(_a.shape[0])
        _blk = np.zeros((_rpad, CONST_W), np.float32)
        _blk[:_a.shape[0], :_a.shape[1]] = _a
        _const_blocks.append(_blk)
        _row += _rpad
CONST_SLAB_NP = np.concatenate(_const_blocks, axis=0)          # (440, 128)

# --------------------------- parameter slab layout ------------------------------
PARAM_W = 128
_PARAM_SPEC = []
for _dd in ("10", "5"):
    _PARAM_SPEC += [(n + _dd, r, c) for (n, r, c) in (
        ("wic", NPAIR, G3), ("wicv", NPAIR, G3), ("wis", IN_CH, G3),
        ("wiz", IN_CH, G3), ("wir", IN_CH, G3), ("wid", IN_CH, G3),
        ("bi", 1, G3), ("wh", HID, G3), ("bh", 1, G3))]
_PARAM_SPEC.append(("fin", 3, 2 * HID))
PARAM_LAYOUT = {}
_poff = 0
for _n, _r, _c in _PARAM_SPEC:
    PARAM_LAYOUT[_n] = (_poff, _r, _c)
    _poff += _round8(_r)
PARAM_ROWS = _poff                                              # 232


# --------------------------------- kernel -------------------------------------
def alphanet_kernel(act_ref, const_ref, param_ref, out_ref):
    act = act_ref[...]                       # (B*T, 51) time-major [x | xi | xj | xi+xj]
    xt = act[:, 0:IN_CH]                     # raw channels (aligned lane slice)

    def cblock(days, name):
        o, r, c = CONST_LAYOUT[(days, name)]
        return const_ref[o:o + r, 0:c]

    def pblock(name):
        o, r, c = PARAM_LAYOUT[name]
        return param_ref[o:o + r, 0:c]

    def gate_inputs(days):
        """All per-window, BN-folded, gate-stacked GRU input activations of one
        branch as a single (nwin*B, 3H) slab.  Every windowed reduction is an
        MXU matmul against a constant matrix; the input-side gate matmul is
        batched over all windows (six group dots, no lane concat)."""
        tag = str(days)
        inv_n1 = 1.0 / (days - 1)
        wm = cblock(days, "Wm")
        wsum = cblock(days, "Wsum")
        wdec = cblock(days, "Wdec")
        wf = cblock(days, "Wf")
        wl = cblock(days, "Wl")
        scat = cblock(days, "S")

        # window means of all 51 activation columns (one MXU pass)
        mu = jnp.dot(wm, act, preferred_element_type=jnp.float32)            # (R, 51)
        # center within each window, then window sums of squares -> variances of
        # [x | x_i | x_j | x_i+x_j]; cov follows from the polarization identity.
        cen = act - jnp.dot(scat, mu, preferred_element_type=jnp.float32)    # (BT, 51)
        ss = jnp.dot(wsum, cen * cen, preferred_element_type=jnp.float32) * inv_n1
        # decay-linear / first / last picks as constant-matrix matmuls
        dec = jnp.dot(wdec, xt, preferred_element_type=jnp.float32)          # (R, C)
        xfirst = jnp.dot(wf, xt, preferred_element_type=jnp.float32)
        xlast = jnp.dot(wl, xt, preferred_element_type=jnp.float32)

        mu_x = mu[:, 0:IN_CH]
        var_x = ss[:, 0:IN_CH]
        var_i = ss[:, IN_CH:IN_CH + NPAIR]
        var_j = ss[:, IN_CH + NPAIR:IN_CH + 2 * NPAIR]
        var_s = ss[:, IN_CH + 2 * NPAIR:IN_CH + 3 * NPAIR]

        std = jnp.sqrt(var_x)
        zsc = mu_x / std
        ret = xlast / xfirst - 1.0                       # exact divide (off crit path)
        cov = (var_s - var_i - var_j) * 0.5              # centered polarization identity
        corr = cov / jnp.sqrt(var_i * var_j)

        # batched, BN-folded input-side gate matmul: six group dots (weight rows
        # pre-split host-side) instead of a 6-way lane concat of the features.
        gi = (jnp.dot(corr, pblock("wic" + tag), preferred_element_type=jnp.float32)
              + jnp.dot(cov, pblock("wicv" + tag), preferred_element_type=jnp.float32)
              + jnp.dot(std, pblock("wis" + tag), preferred_element_type=jnp.float32)
              + jnp.dot(zsc, pblock("wiz" + tag), preferred_element_type=jnp.float32)
              + jnp.dot(ret, pblock("wir" + tag), preferred_element_type=jnp.float32)
              + jnp.dot(dec, pblock("wid" + tag), preferred_element_type=jnp.float32)
              + pblock("bi" + tag))
        return gi                                        # (nwin*B, 3H)

    def gru_chain(gi_all, days):
        """Serial GRU recurrence; only the (B,H)@(H,3H) hidden-side dot is per-step."""
        tag = str(days)
        nwin = TIME // days
        wh = pblock("wh" + tag)                          # (H, 3H), loaded next to its dots
        bh = pblock("bh" + tag)                          # (1, 3H)
        h = jnp.zeros((B, HID), jnp.float32)
        for w in range(nwin):
            gi = gi_all[w * B:(w + 1) * B, :]
            if w == 0:
                gh = bh                                  # h0 == 0 -> skip the dot
            else:
                gh = jnp.dot(h, wh, preferred_element_type=jnp.float32) + bh
            r = jax.nn.sigmoid(gi[:, 0:HID] + gh[:, 0:HID])
            z = jax.nn.sigmoid(gi[:, HID:2 * HID] + gh[:, HID:2 * HID])
            n = jnp.tanh(gi[:, 2 * HID:G3] + r * gh[:, 2 * HID:G3])
            h = (1.0 - z) * n + z * h
        return h

    # Non-recurrent work for both branches first, then both recurrences in the
    # same unrolled block so their serial chains interleave on the scheduler.
    gi10 = gate_inputs(10)
    gi5 = gate_inputs(5)
    h10 = gru_chain(gi10, 10)
    h5 = gru_chain(gi5, 5)

    fo, _, _ = PARAM_LAYOUT["fin"]
    lw10 = param_ref[fo:fo + 1, 0:HID]                   # hidden-BN folded final weights
    lw5 = param_ref[fo + 1:fo + 2, 0:HID]
    lb = param_ref[fo + 2:fo + 3, 0:1]
    # Final projection: elementwise multiply + one lane reduce (no degenerate N=1 dots).
    out_ref[...] = jnp.sum(h10 * lw10 + h5 * lw5, axis=-1, keepdims=True) + lb


@jax.jit
def alphanet_forward(x, const_slab, param_slab):
    # Host-side layout plumbing: time-major slab with gathered pair columns so every
    # in-kernel window reduction is a dense matmul, and only 3 operands cross the
    # pallas_call boundary (activations / constants / parameters).
    xt = jnp.transpose(x, (0, 2, 1)).reshape(B * TIME, IN_CH)
    xi = xt[:, IDX_I]
    xj = xt[:, IDX_J]
    act = jnp.concatenate([xt, xi, xj, xi + xj], axis=-1).astype(jnp.float32)  # (BT, 51)
    return pl.pallas_call(
        alphanet_kernel,
        out_shape=jax.ShapeDtypeStruct((B, 1), jnp.float32),
        in_specs=[pl.BlockSpec(memory_space=pltpu.MemorySpace.VMEM)] * 3,
        out_specs=pl.BlockSpec(memory_space=pltpu.MemorySpace.VMEM),
    )(act, const_slab, param_slab)


# --------------------- host-side parameter folding / packing -------------------
def pack_params(raw):
    """Fold BN affines into the GRU/linear weights, split the input-side gate weight
    into feature-group row blocks, and pack everything into one (232, 128) slab."""
    hp = jax.lax.Precision.HIGHEST
    blocks = {}
    for d in ("10", "5"):
        Wi = raw["Wih" + d].T                                   # (CH2, 3H), cols r|z|n
        wi_f = Wi * raw["scale" + d][:, None]                   # fold feature-BN scale
        bi_f = (jnp.dot(raw["shift" + d][None, :], Wi, precision=hp)
                + raw["bih" + d][None, :])                      # fold feature-BN shift
        ofs = 0
        for name, width in (("wic", NPAIR), ("wicv", NPAIR), ("wis", IN_CH),
                            ("wiz", IN_CH), ("wir", IN_CH), ("wid", IN_CH)):
            blocks[name + d] = wi_f[ofs:ofs + width]
            ofs += width
        blocks["bi" + d] = bi_f
        blocks["wh" + d] = raw["Whh" + d].T                     # (H, 3H)
        blocks["bh" + d] = raw["bhh" + d][None, :]              # (1, 3H)
    linW = raw["linW"]                                          # (1, 2H)
    lw10 = raw["bn10_scale"] * linW[0, :HID]                    # fold hidden BN
    lw5 = raw["bn5_scale"] * linW[0, HID:]
    lb = (raw["linb"][0]
          + jnp.sum(raw["bn10_shift"] * linW[0, :HID])
          + jnp.sum(raw["bn5_shift"] * linW[0, HID:]))
    fin = jnp.zeros((3, 2 * HID), jnp.float32)
    fin = fin.at[0, :HID].set(lw10).at[1, :HID].set(lw5).at[2, 0].set(lb)
    blocks["fin"] = fin

    slabs = []
    for name, r, c in _PARAM_SPEC:
        a = jnp.asarray(blocks[name], jnp.float32)
        slabs.append(jnp.pad(a, ((0, _round8(r) - r), (0, PARAM_W - c))))
    return jnp.concatenate(slabs, axis=0)                       # (PARAM_ROWS, 128)


# --------------------------- pure-JAX reference --------------------------------
def _reference_forward(x, raw):
    hp = jax.lax.Precision.HIGHEST
    Bsz, C, T = x.shape
    H = HID

    def ts_features(days):
        nwin = T // days
        dw = (jnp.arange(1, days + 1, dtype=jnp.float32)
              / (days * (days + 1) / 2.0)).reshape(1, 1, days)
        steps = []
        for w in range(nwin):
            xw = x[:, :, w * days:(w + 1) * days]
            mu = jnp.mean(xw, axis=-1)
            xc = xw - mu[:, :, None]
            std = jnp.sqrt(jnp.sum(xc * xc, axis=-1) / (days - 1))
            corr_cols, cov_cols = [], []
            for (i, j) in PAIRS:
                cij = jnp.sum(xc[:, i, :] * xc[:, j, :], axis=-1, keepdims=True) / (days - 1)
                cov_cols.append(cij)
                corr_cols.append(cij / (std[:, i:i + 1] * std[:, j:j + 1]))
            feat = jnp.concatenate(
                corr_cols + cov_cols
                + [std, mu / std, xw[:, :, -1] / xw[:, :, 0] - 1.0,
                   jnp.sum(xw * dw, axis=-1)], axis=-1)
            steps.append(feat)
        return jnp.stack(steps, axis=1)                          # (B, nwin, CH2)

    def gru(seq, Wih, Whh, bih, bhh):
        h = jnp.zeros((Bsz, H), jnp.float32)
        for t in range(seq.shape[1]):
            xt_ = seq[:, t]
            gi = jnp.dot(xt_, Wih.T, precision=hp) + bih
            gh = jnp.dot(h, Whh.T, precision=hp) + bhh
            r = jax.nn.sigmoid(gi[:, :H] + gh[:, :H])
            z = jax.nn.sigmoid(gi[:, H:2 * H] + gh[:, H:2 * H])
            n = jnp.tanh(gi[:, 2 * H:] + r * gh[:, 2 * H:])
            h = (1.0 - z) * n + z * h
        return h

    seq10 = ts_features(10) * raw['scale10'] + raw['shift10']
    seq5 = ts_features(5) * raw['scale5'] + raw['shift5']
    h10 = gru(seq10, raw['Wih10'], raw['Whh10'], raw['bih10'], raw['bhh10'])
    h5 = gru(seq5, raw['Wih5'], raw['Whh5'], raw['bih5'], raw['bhh5'])
    h10 = h10 * raw['bn10_scale'] + raw['bn10_shift']
    h5 = h5 * raw['bn5_scale'] + raw['bn5_shift']
    hcat = jnp.concatenate([h10, h5], axis=-1)
    return jnp.dot(hcat, raw['linW'].T, precision=hp) + raw['linb']


# ---------------------------- parameter setup ----------------------------------
def _bn_affine(key, n):
    k1, k2, k3, k4 = jax.random.split(key, 4)
    gamma = 1.0 + 0.1 * jax.random.normal(k1, (n,), jnp.float32)
    beta = 0.1 * jax.random.normal(k2, (n,), jnp.float32)
    mean = 0.1 * jax.random.normal(k3, (n,), jnp.float32)
    var = jnp.abs(1.0 + 0.1 * jax.random.normal(k4, (n,), jnp.float32))
    scale = gamma / jnp.sqrt(var + 1e-5)
    shift = beta - mean * scale
    return scale, shift


def _gru_params(key, in_dim, hid):
    bound = 1.0 / float(hid) ** 0.5
    k1, k2, k3, k4 = jax.random.split(key, 4)
    Wih = jax.random.uniform(k1, (3 * hid, in_dim), jnp.float32, -bound, bound)
    Whh = jax.random.uniform(k2, (3 * hid, hid), jnp.float32, -bound, bound)
    bih = jax.random.uniform(k3, (3 * hid,), jnp.float32, -bound, bound)
    bhh = jax.random.uniform(k4, (3 * hid,), jnp.float32, -bound, bound)
    return Wih, Whh, bih, bhh


def init_raw_params(key):
    ks = jax.random.split(key, 8)
    raw = {}
    raw['scale10'], raw['shift10'] = _bn_affine(ks[0], CH2)
    raw['scale5'], raw['shift5'] = _bn_affine(ks[1], CH2)
    raw['Wih10'], raw['Whh10'], raw['bih10'], raw['bhh10'] = _gru_params(ks[2], CH2, HID)
    raw['Wih5'], raw['Whh5'], raw['bih5'], raw['bhh5'] = _gru_params(ks[3], CH2, HID)
    raw['bn10_scale'], raw['bn10_shift'] = _bn_affine(ks[4], HID)
    raw['bn5_scale'], raw['bn5_shift'] = _bn_affine(ks[5], HID)
    raw['linW'] = jax.random.truncated_normal(
        ks[6], -2.0, 2.0, (1, 2 * HID)).astype(jnp.float32)
    bound = 1.0 / float(2 * HID) ** 0.5
    raw['linb'] = jax.random.uniform(ks[7], (1,), jnp.float32, -bound, bound)
    return raw


# ------------------------------------ main --------------------------------------
if __name__ == "__main__":
    key = jax.random.PRNGKey(0)
    kx, kp = jax.random.split(key)
    # positive, price-like inputs so TS_Return / corr denominators are well-behaved
    x = jnp.exp(0.1 * jax.random.normal(kx, (B, IN_CH, TIME), jnp.float32))
    raw = init_raw_params(kp)
    param_slab = pack_params(raw)
    const_slab = jnp.asarray(CONST_SLAB_NP)

    out = alphanet_forward(x, const_slab, param_slab)
    out = jax.block_until_ready(out)
    assert out.shape == (B, 1)

    ref = _reference_forward(x, raw)
    err = float(jnp.max(jnp.abs(out - ref)))
    tol = 5e-4 * (1.0 + float(jnp.max(jnp.abs(ref))))
    if not err < tol:
        raise AssertionError(f"kernel/reference mismatch: max abs err = {err} (tol {tol})")

    print("KERNEL_OK")
</pallas_src>

<mosaic_0001>
module attributes {stable_mosaic.version = 11 : i64} {
  func.func @alphanet_kernel(%arg0: memref<120x51xf32, #tpu.memory_space<vmem>>, %arg1: memref<440x128xf32, #tpu.memory_space<vmem>>, %arg2: memref<232x128xf32, #tpu.memory_space<vmem>>, %arg3: memref<4x1xf32, #tpu.memory_space<vmem>>) attributes {dimension_semantics = [], scalar_prefetch = 0 : i64, scratch_operands = 0 : i64, tpu.core_type = #tpu.core_type<tc>} {
    %c0 = arith.constant 0 : index
    %c0_0 = arith.constant 0 : index
    %0 = vector.load %arg0[%c0, %c0_0] : memref<120x51xf32, #tpu.memory_space<vmem>>, vector<120x51xf32>
    %1 = vector.extract_strided_slice %0 {offsets = [0, 0], sizes = [120, 6], strides = [1, 1]} : vector<120x51xf32> to vector<120x6xf32>
    %c0_1 = arith.constant 0 : index
    %c0_2 = arith.constant 0 : index
    %2 = vector.load %arg1[%c0_1, %c0_2] : memref<440x128xf32, #tpu.memory_space<vmem>>, vector<12x120xf32>
    %c16 = arith.constant 16 : index
    %c0_3 = arith.constant 0 : index
    %3 = vector.load %arg1[%c16, %c0_3] : memref<440x128xf32, #tpu.memory_space<vmem>>, vector<12x120xf32>
    %c32 = arith.constant 32 : index
    %c0_4 = arith.constant 0 : index
    %4 = vector.load %arg1[%c32, %c0_4] : memref<440x128xf32, #tpu.memory_space<vmem>>, vector<12x120xf32>
    %c48 = arith.constant 48 : index
    %c0_5 = arith.constant 0 : index
    %5 = vector.load %arg1[%c48, %c0_5] : memref<440x128xf32, #tpu.memory_space<vmem>>, vector<12x120xf32>
    %c64 = arith.constant 64 : index
    %c0_6 = arith.constant 0 : index
    %6 = vector.load %arg1[%c64, %c0_6] : memref<440x128xf32, #tpu.memory_space<vmem>>, vector<12x120xf32>
    %c80 = arith.constant 80 : index
    %c0_7 = arith.constant 0 : index
    %7 = vector.load %arg1[%c80, %c0_7] : memref<440x128xf32, #tpu.memory_space<vmem>>, vector<120x12xf32>
    %cst = arith.constant dense<0.000000e+00> : vector<12x51xf32>
    %8 = tpu.matmul %2, %0, %cst {dimension_numbers = #tpu.dot_dimension_numbers<[1], [0], [0], [1], [0, 0, 1, 1], [], []>} : vector<12x120xf32>, vector<120x51xf32>, vector<12x51xf32> -> vector<12x51xf32>
    %cst_8 = arith.constant dense<0.000000e+00> : vector<120x51xf32>
    %9 = tpu.matmul %7, %8, %cst_8 {dimension_numbers = #tpu.dot_dimension_numbers<[1], [0], [0], [1], [0, 0, 1, 1], [], []>} : vector<120x12xf32>, vector<12x51xf32>, vector<120x51xf32> -> vector<120x51xf32>
    %10 = arith.subf %0, %9 : vector<120x51xf32>
    %11 = arith.mulf %10, %10 : vector<120x51xf32>
    %cst_9 = arith.constant dense<0.000000e+00> : vector<12x51xf32>
    %12 = tpu.matmul %3, %11, %cst_9 {dimension_numbers = #tpu.dot_dimension_numbers<[1], [0], [0], [1], [0, 0, 1, 1], [], []>} : vector<12x120xf32>, vector<120x51xf32>, vector<12x51xf32> -> vector<12x51xf32>
    %cst_10 = arith.constant 0.111111112 : f32
    %13 = vector.broadcast %cst_10 : f32 to vector<12x51xf32>
    %14 = arith.mulf %12, %13 : vector<12x51xf32>
    %cst_11 = arith.constant dense<0.000000e+00> : vector<12x6xf32>
    %15 = tpu.matmul %4, %1, %cst_11 {dimension_numbers = #tpu.dot_dimension_numbers<[1], [0], [0], [1], [0, 0, 1, 1], [], []>} : vector<12x120xf32>, vector<120x6xf32>, vector<12x6xf32> -> vector<12x6xf32>
    %cst_12 = arith.constant dense<0.000000e+00> : vector<12x6xf32>
    %16 = tpu.matmul %5, %1, %cst_12 {dimension_numbers = #tpu.dot_dimension_numbers<[1], [0], [0], [1], [0, 0, 1, 1], [], []>} : vector<12x120xf32>, vector<120x6xf32>, vector<12x6xf32> -> vector<12x6xf32>
    %cst_13 = arith.constant dense<0.000000e+00> : vector<12x6xf32>
    %17 = tpu.matmul %6, %1, %cst_13 {dimension_numbers = #tpu.dot_dimension_numbers<[1], [0], [0], [1], [0, 0, 1, 1], [], []>} : vector<12x120xf32>, vector<120x6xf32>, vector<12x6xf32> -> vector<12x6xf32>
    %18 = vector.extract_strided_slice %8 {offsets = [0, 0], sizes = [12, 6], strides = [1, 1]} : vector<12x51xf32> to vector<12x6xf32>
    %19 = vector.extract_strided_slice %14 {offsets = [0, 0], sizes = [12, 6], strides = [1, 1]} : vector<12x51xf32> to vector<12x6xf32>
    %20 = vector.extract_strided_slice %14 {offsets = [0, 6], sizes = [12, 15], strides = [1, 1]} : vector<12x51xf32> to vector<12x15xf32>
    %21 = vector.extract_strided_slice %14 {offsets = [0, 21], sizes = [12, 15], strides = [1, 1]} : vector<12x51xf32> to vector<12x15xf32>
    %22 = vector.extract_strided_slice %14 {offsets = [0, 36], sizes = [12, 15], strides = [1, 1]} : vector<12x51xf32> to vector<12x15xf32>
    %23 = math.sqrt %19 : vector<12x6xf32>
    %24 = arith.divf %18, %23 : vector<12x6xf32>
    %25 = arith.divf %17, %16 : vector<12x6xf32>
    %cst_14 = arith.constant 1.000000e+00 : f32
    %26 = vector.broadcast %cst_14 : f32 to vector<12x6xf32>
    %27 = arith.subf %25, %26 : vector<12x6xf32>
    %28 = arith.subf %22, %20 : vector<12x15xf32>
    %29 = arith.subf %28, %21 : vector<12x15xf32>
    %cst_15 = arith.constant 5.000000e-01 : f32
    %30 = vector.broadcast %cst_15 : f32 to vector<12x15xf32>
    %31 = arith.mulf %29, %30 : vector<12x15xf32>
    %32 = arith.mulf %20, %21 : vector<12x15xf32>
    %33 = math.sqrt %32 : vector<12x15xf32>
    %34 = arith.divf %31, %33 : vector<12x15xf32>
    %c0_16 = arith.constant 0 : index
    %c0_17 = arith.constant 0 : index
    %35 = vector.load %arg2[%c0_16, %c0_17] : memref<232x128xf32, #tpu.memory_space<vmem>>, vector<15x90xf32>
    %cst_18 = arith.constant dense<0.000000e+00> : vector<12x90xf32>
    %36 = tpu.matmul %34, %35, %cst_18 {dimension_numbers = #tpu.dot_dimension_numbers<[1], [0], [0], [1], [0, 0, 1, 1], [], []>} : vector<12x15xf32>, vector<15x90xf32>, vector<12x90xf32> -> vector<12x90xf32>
    %c16_19 = arith.constant 16 : index
    %c0_20 = arith.constant 0 : index
    %37 = vector.load %arg2[%c16_19, %c0_20] : memref<232x128xf32, #tpu.memory_space<vmem>>, vector<15x90xf32>
    %cst_21 = arith.constant dense<0.000000e+00> : vector<12x90xf32>
    %38 = tpu.matmul %31, %37, %cst_21 {dimension_numbers = #tpu.dot_dimension_numbers<[1], [0], [0], [1], [0, 0, 1, 1], [], []>} : vector<12x15xf32>, vector<15x90xf32>, vector<12x90xf32> -> vector<12x90xf32>
    %39 = arith.addf %36, %38 : vector<12x90xf32>
    %c32_22 = arith.constant 32 : index
    %c0_23 = arith.constant 0 : index
    %40 = vector.load %arg2[%c32_22, %c0_23] : memref<232x128xf32, #tpu.memory_space<vmem>>, vector<6x90xf32>
    %cst_24 = arith.constant dense<0.000000e+00> : vector<12x90xf32>
    %41 = tpu.matmul %23, %40, %cst_24 {dimension_numbers = #tpu.dot_dimension_numbers<[1], [0], [0], [1], [0, 0, 1, 1], [], []>} : vector<12x6xf32>, vector<6x90xf32>, vector<12x90xf32> -> vector<12x90xf32>
    %42 = arith.addf %39, %41 : vector<12x90xf32>
    %c40 = arith.constant 40 : index
    %c0_25 = arith.constant 0 : index
    %43 = vector.load %arg2[%c40, %c0_25] : memref<232x128xf32, #tpu.memory_space<vmem>>, vector<6x90xf32>
    %cst_26 = arith.constant dense<0.000000e+00> : vector<12x90xf32>
    %44 = tpu.matmul %24, %43, %cst_26 {dimension_numbers = #tpu.dot_dimension_numbers<[1], [0], [0], [1], [0, 0, 1, 1], [], []>} : vector<12x6xf32>, vector<6x90xf32>, vector<12x90xf32> -> vector<12x90xf32>
    %45 = arith.addf %42, %44 : vector<12x90xf32>
    %c48_27 = arith.constant 48 : index
    %c0_28 = arith.constant 0 : index
    %46 = vector.load %arg2[%c48_27, %c0_28] : memref<232x128xf32, #tpu.memory_space<vmem>>, vector<6x90xf32>
    %cst_29 = arith.constant dense<0.000000e+00> : vector<12x90xf32>
    %47 = tpu.matmul %27, %46, %cst_29 {dimension_numbers = #tpu.dot_dimension_numbers<[1], [0], [0], [1], [0, 0, 1, 1], [], []>} : vector<12x6xf32>, vector<6x90xf32>, vector<12x90xf32> -> vector<12x90xf32>
    %48 = arith.addf %45, %47 : vector<12x90xf32>
    %c56 = arith.constant 56 : index
    %c0_30 = arith.constant 0 : index
    %49 = vector.load %arg2[%c56, %c0_30] : memref<232x128xf32, #tpu.memory_space<vmem>>, vector<6x90xf32>
    %cst_31 = arith.constant dense<0.000000e+00> : vector<12x90xf32>
    %50 = tpu.matmul %15, %49, %cst_31 {dimension_numbers = #tpu.dot_dimension_numbers<[1], [0], [0], [1], [0, 0, 1, 1], [], []>} : vector<12x6xf32>, vector<6x90xf32>, vector<12x90xf32> -> vector<12x90xf32>
    %51 = arith.addf %48, %50 : vector<12x90xf32>
    %c64_32 = arith.constant 64 : index
    %c0_33 = arith.constant 0 : index
    %52 = vector.load %arg2[%c64_32, %c0_33] : memref<232x128xf32, #tpu.memory_space<vmem>>, vector<1x90xf32>
    %53 = vector.broadcast %52 : vector<1x90xf32> to vector<12x90xf32>
    %54 = arith.addf %51, %53 : vector<12x90xf32>
    %c200 = arith.constant 200 : index
    %c0_34 = arith.constant 0 : index
    %55 = vector.load %arg1[%c200, %c0_34] : memref<440x128xf32, #tpu.memory_space<vmem>>, vector<24x120xf32>
    %c224 = arith.constant 224 : index
    %c0_35 = arith.constant 0 : index
    %56 = vector.load %arg1[%c224, %c0_35] : memref<440x128xf32, #tpu.memory_space<vmem>>, vector<24x120xf32>
    %c248 = arith.constant 248 : index
    %c0_36 = arith.constant 0 : index
    %57 = vector.load %arg1[%c248, %c0_36] : memref<440x128xf32, #tpu.memory_space<vmem>>, vector<24x120xf32>
    %c272 = arith.constant 272 : index
    %c0_37 = arith.constant 0 : index
    %58 = vector.load %arg1[%c272, %c0_37] : memref<440x128xf32, #tpu.memory_space<vmem>>, vector<24x120xf32>
    %c296 = arith.constant 296 : index
    %c0_38 = arith.constant 0 : index
    %59 = vector.load %arg1[%c296, %c0_38] : memref<440x128xf32, #tpu.memory_space<vmem>>, vector<24x120xf32>
    %c320 = arith.constant 320 : index
    %c0_39 = arith.constant 0 : index
    %60 = vector.load %arg1[%c320, %c0_39] : memref<440x128xf32, #tpu.memory_space<vmem>>, vector<120x24xf32>
    %cst_40 = arith.constant dense<0.000000e+00> : vector<24x51xf32>
    %61 = tpu.matmul %55, %0, %cst_40 {dimension_numbers = #tpu.dot_dimension_numbers<[1], [0], [0], [1], [0, 0, 1, 1], [], []>} : vector<24x120xf32>, vector<120x51xf32>, vector<24x51xf32> -> vector<24x51xf32>
    %cst_41 = arith.constant dense<0.000000e+00> : vector<120x51xf32>
    %62 = tpu.matmul %60, %61, %cst_41 {dimension_numbers = #tpu.dot_dimension_numbers<[1], [0], [0], [1], [0, 0, 1, 1], [], []>} : vector<120x24xf32>, vector<24x51xf32>, vector<120x51xf32> -> vector<120x51xf32>
    %63 = arith.subf %0, %62 : vector<120x51xf32>
    %64 = arith.mulf %63, %63 : vector<120x51xf32>
    %cst_42 = arith.constant dense<0.000000e+00> : vector<24x51xf32>
    %65 = tpu.matmul %56, %64, %cst_42 {dimension_numbers = #tpu.dot_dimension_numbers<[1], [0], [0], [1], [0, 0, 1, 1], [], []>} : vector<24x120xf32>, vector<120x51xf32>, vector<24x51xf32> -> vector<24x51xf32>
    %cst_43 = arith.constant 2.500000e-01 : f32
    %66 = vector.broadcast %cst_43 : f32 to vector<24x51xf32>
    %67 = arith.mulf %65, %66 : vector<24x51xf32>
    %cst_44 = arith.constant dense<0.000000e+00> : vector<24x6xf32>
    %68 = tpu.matmul %57, %1, %cst_44 {dimension_numbers = #tpu.dot_dimension_numbers<[1], [0], [0], [1], [0, 0, 1, 1], [], []>} : vector<24x120xf32>, vector<120x6xf32>, vector<24x6xf32> -> vector<24x6xf32>
    %cst_45 = arith.constant dense<0.000000e+00> : vector<24x6xf32>
    %69 = tpu.matmul %58, %1, %cst_45 {dimension_numbers = #tpu.dot_dimension_numbers<[1], [0], [0], [1], [0, 0, 1, 1], [], []>} : vector<24x120xf32>, vector<120x6xf32>, vector<24x6xf32> -> vector<24x6xf32>
    %cst_46 = arith.constant dense<0.000000e+00> : vector<24x6xf32>
    %70 = tpu.matmul %59, %1, %cst_46 {dimension_numbers = #tpu.dot_dimension_numbers<[1], [0], [0], [1], [0, 0, 1, 1], [], []>} : vector<24x120xf32>, vector<120x6xf32>, vector<24x6xf32> -> vector<24x6xf32>
    %71 = vector.extract_strided_slice %61 {offsets = [0, 0], sizes = [24, 6], strides = [1, 1]} : vector<24x51xf32> to vector<24x6xf32>
    %72 = vector.extract_strided_slice %67 {offsets = [0, 0], sizes = [24, 6], strides = [1, 1]} : vector<24x51xf32> to vector<24x6xf32>
    %73 = vector.extract_strided_slice %67 {offsets = [0, 6], sizes = [24, 15], strides = [1, 1]} : vector<24x51xf32> to vector<24x15xf32>
    %74 = vector.extract_strided_slice %67 {offsets = [0, 21], sizes = [24, 15], strides = [1, 1]} : vector<24x51xf32> to vector<24x15xf32>
    %75 = vector.extract_strided_slice %67 {offsets = [0, 36], sizes = [24, 15], strides = [1, 1]} : vector<24x51xf32> to vector<24x15xf32>
    %76 = math.sqrt %72 : vector<24x6xf32>
    %77 = arith.divf %71, %76 : vector<24x6xf32>
    %78 = arith.divf %70, %69 : vector<24x6xf32>
    %cst_47 = arith.constant 1.000000e+00 : f32
    %79 = vector.broadcast %cst_47 : f32 to vector<24x6xf32>
    %80 = arith.subf %78, %79 : vector<24x6xf32>
    %81 = arith.subf %75, %73 : vector<24x15xf32>
    %82 = arith.subf %81, %74 : vector<24x15xf32>
    %cst_48 = arith.constant 5.000000e-01 : f32
    %83 = vector.broadcast %cst_48 : f32 to vector<24x15xf32>
    %84 = arith.mulf %82, %83 : vector<24x15xf32>
    %85 = arith.mulf %73, %74 : vector<24x15xf32>
    %86 = math.sqrt %85 : vector<24x15xf32>
    %87 = arith.divf %84, %86 : vector<24x15xf32>
    %c112 = arith.constant 112 : index
    %c0_49 = arith.constant 0 : index
    %88 = vector.load %arg2[%c112, %c0_49] : memref<232x128xf32, #tpu.memory_space<vmem>>, vector<15x90xf32>
    %cst_50 = arith.constant dense<0.000000e+00> : vector<24x90xf32>
    %89 = tpu.matmul %87, %88, %cst_50 {dimension_numbers = #tpu.dot_dimension_numbers<[1], [0], [0], [1], [0, 0, 1, 1], [], []>} : vector<24x15xf32>, vector<15x90xf32>, vector<24x90xf32> -> vector<24x90xf32>
    %c128 = arith.constant 128 : index
    %c0_51 = arith.constant 0 : index
    %90 = vector.load %arg2[%c128, %c0_51] : memref<232x128xf32, #tpu.memory_space<vmem>>, vector<15x90xf32>
    %cst_52 = arith.constant dense<0.000000e+00> : vector<24x90xf32>
    %91 = tpu.matmul %84, %90, %cst_52 {dimension_numbers = #tpu.dot_dimension_numbers<[1], [0], [0], [1], [0, 0, 1, 1], [], []>} : vector<24x15xf32>, vector<15x90xf32>, vector<24x90xf32> -> vector<24x90xf32>
    %92 = arith.addf %89, %91 : vector<24x90xf32>
    %c144 = arith.constant 144 : index
    %c0_53 = arith.constant 0 : index
    %93 = vector.load %arg2[%c144, %c0_53] : memref<232x128xf32, #tpu.memory_space<vmem>>, vector<6x90xf32>
    %cst_54 = arith.constant dense<0.000000e+00> : vector<24x90xf32>
    %94 = tpu.matmul %76, %93, %cst_54 {dimension_numbers = #tpu.dot_dimension_numbers<[1], [0], [0], [1], [0, 0, 1, 1], [], []>} : vector<24x6xf32>, vector<6x90xf32>, vector<24x90xf32> -> vector<24x90xf32>
    %95 = arith.addf %92, %94 : vector<24x90xf32>
    %c152 = arith.constant 152 : index
    %c0_55 = arith.constant 0 : index
    %96 = vector.load %arg2[%c152, %c0_55] : memref<232x128xf32, #tpu.memory_space<vmem>>, vector<6x90xf32>
    %cst_56 = arith.constant dense<0.000000e+00> : vector<24x90xf32>
    %97 = tpu.matmul %77, %96, %cst_56 {dimension_numbers = #tpu.dot_dimension_numbers<[1], [0], [0], [1], [0, 0, 1, 1], [], []>} : vector<24x6xf32>, vector<6x90xf32>, vector<24x90xf32> -> vector<24x90xf32>
    %98 = arith.addf %95, %97 : vector<24x90xf32>
    %c160 = arith.constant 160 : index
    %c0_57 = arith.constant 0 : index
    %99 = vector.load %arg2[%c160, %c0_57] : memref<232x128xf32, #tpu.memory_space<vmem>>, vector<6x90xf32>
    %cst_58 = arith.constant dense<0.000000e+00> : vector<24x90xf32>
    %100 = tpu.matmul %80, %99, %cst_58 {dimension_numbers = #tpu.dot_dimension_numbers<[1], [0], [0], [1], [0, 0, 1, 1], [], []>} : vector<24x6xf32>, vector<6x90xf32>, vector<24x90xf32> -> vector<24x90xf32>
    %101 = arith.addf %98, %100 : vector<24x90xf32>
    %c168 = arith.constant 168 : index
    %c0_59 = arith.constant 0 : index
    %102 = vector.load %arg2[%c168, %c0_59] : memref<232x128xf32, #tpu.memory_space<vmem>>, vector<6x90xf32>
    %cst_60 = arith.constant dense<0.000000e+00> : vector<24x90xf32>
    %103 = tpu.matmul %68, %102, %cst_60 {dimension_numbers = #tpu.dot_dimension_numbers<[1], [0], [0], [1], [0, 0, 1, 1], [], []>} : vector<24x6xf32>, vector<6x90xf32>, vector<24x90xf32> -> vector<24x90xf32>
    %104 = arith.addf %101, %103 : vector<24x90xf32>
    %c176 = arith.constant 176 : index
    %c0_61 = arith.constant 0 : index
    %105 = vector.load %arg2[%c176, %c0_61] : memref<232x128xf32, #tpu.memory_space<vmem>>, vector<1x90xf32>
    %106 = vector.broadcast %105 : vector<1x90xf32> to vector<24x90xf32>
    %107 = arith.addf %104, %106 : vector<24x90xf32>
    %c72 = arith.constant 72 : index
    %c0_62 = arith.constant 0 : index
    %108 = vector.load %arg2[%c72, %c0_62] : memref<232x128xf32, #tpu.memory_space<vmem>>, vector<30x90xf32>
    %c104 = arith.constant 104 : index
    %c0_63 = arith.constant 0 : index
    %109 = vector.load %arg2[%c104, %c0_63] : memref<232x128xf32, #tpu.memory_space<vmem>>, vector<1x90xf32>
    %cst_64 = arith.constant 0.000000e+00 : f32
    %110 = vector.broadcast %cst_64 : f32 to vector<4x30xf32>
    %111 = vector.extract_strided_slice %54 {offsets = [0, 0], sizes = [4, 90], strides = [1, 1]} : vector<12x90xf32> to vector<4x90xf32>
    %112 = vector.extract_strided_slice %111 {offsets = [0, 0], sizes = [4, 30], strides = [1, 1]} : vector<4x90xf32> to vector<4x30xf32>
    %113 = vector.extract_strided_slice %109 {offsets = [0, 0], sizes = [1, 30], strides = [1, 1]} : vector<1x90xf32> to vector<1x30xf32>
    %114 = vector.broadcast %113 : vector<1x30xf32> to vector<4x30xf32>
    %115 = arith.addf %112, %114 : vector<4x30xf32>
    %116 = arith.negf %115 : vector<4x30xf32>
    %117 = math.exp %116 : vector<4x30xf32>
    %cst_65 = arith.constant 1.000000e+00 : f32
    %118 = vector.broadcast %cst_65 : f32 to vector<4x30xf32>
    %119 = arith.addf %118, %117 : vector<4x30xf32>
    %120 = arith.divf %118, %119 : vector<4x30xf32>
    %121 = vector.extract_strided_slice %111 {offsets = [0, 30], sizes = [4, 30], strides = [1, 1]} : vector<4x90xf32> to vector<4x30xf32>
    %122 = vector.extract_strided_slice %109 {offsets = [0, 30], sizes = [1, 30], strides = [1, 1]} : vector<1x90xf32> to vector<1x30xf32>
    %123 = vector.broadcast %122 : vector<1x30xf32> to vector<4x30xf32>
    %124 = arith.addf %121, %123 : vector<4x30xf32>
    %125 = arith.negf %124 : vector<4x30xf32>
    %126 = math.exp %125 : vector<4x30xf32>
    %cst_66 = arith.constant 1.000000e+00 : f32
    %127 = vector.broadcast %cst_66 : f32 to vector<4x30xf32>
    %128 = arith.addf %127, %126 : vector<4x30xf32>
    %129 = arith.divf %127, %128 : vector<4x30xf32>
    %130 = vector.extract_strided_slice %111 {offsets = [0, 60], sizes = [4, 30], strides = [1, 1]} : vector<4x90xf32> to vector<4x30xf32>
    %131 = vector.extract_strided_slice %109 {offsets = [0, 60], sizes = [1, 30], strides = [1, 1]} : vector<1x90xf32> to vector<1x30xf32>
    %132 = vector.broadcast %131 : vector<1x30xf32> to vector<4x30xf32>
    %133 = arith.mulf %120, %132 : vector<4x30xf32>
    %134 = arith.addf %130, %133 : vector<4x30xf32>
    %135 = math.tanh %134 : vector<4x30xf32>
    %cst_67 = arith.constant 1.000000e+00 : f32
    %136 = vector.broadcast %cst_67 : f32 to vector<4x30xf32>
    %137 = arith.subf %136, %129 : vector<4x30xf32>
    %138 = arith.mulf %137, %135 : vector<4x30xf32>
    %139 = arith.mulf %129, %110 : vector<4x30xf32>
    %140 = arith.addf %138, %139 : vector<4x30xf32>
    %141 = vector.extract_strided_slice %54 {offsets = [4, 0], sizes = [4, 90], strides = [1, 1]} : vector<12x90xf32> to vector<4x90xf32>
    %cst_68 = arith.constant dense<0.000000e+00> : vector<4x90xf32>
    %142 = tpu.matmul %140, %108, %cst_68 {dimension_numbers = #tpu.dot_dimension_numbers<[1], [0], [0], [1], [0, 0, 1, 1], [], []>} : vector<4x30xf32>, vector<30x90xf32>, vector<4x90xf32> -> vector<4x90xf32>
    %143 = vector.broadcast %109 : vector<1x90xf32> to vector<4x90xf32>
    %144 = arith.addf %142, %143 : vector<4x90xf32>
    %145 = vector.extract_strided_slice %141 {offsets = [0, 0], sizes = [4, 30], strides = [1, 1]} : vector<4x90xf32> to vector<4x30xf32>
    %146 = vector.extract_strided_slice %144 {offsets = [0, 0], sizes = [4, 30], strides = [1, 1]} : vector<4x90xf32> to vector<4x30xf32>
    %147 = arith.addf %145, %146 : vector<4x30xf32>
    %148 = arith.negf %147 : vector<4x30xf32>
    %149 = math.exp %148 : vector<4x30xf32>
    %cst_69 = arith.constant 1.000000e+00 : f32
    %150 = vector.broadcast %cst_69 : f32 to vector<4x30xf32>
    %151 = arith.addf %150, %149 : vector<4x30xf32>
    %152 = arith.divf %150, %151 : vector<4x30xf32>
    %153 = vector.extract_strided_slice %141 {offsets = [0, 30], sizes = [4, 30], strides = [1, 1]} : vector<4x90xf32> to vector<4x30xf32>
    %154 = vector.extract_strided_slice %144 {offsets = [0, 30], sizes = [4, 30], strides = [1, 1]} : vector<4x90xf32> to vector<4x30xf32>
    %155 = arith.addf %153, %154 : vector<4x30xf32>
    %156 = arith.negf %155 : vector<4x30xf32>
    %157 = math.exp %156 : vector<4x30xf32>
    %cst_70 = arith.constant 1.000000e+00 : f32
    %158 = vector.broadcast %cst_70 : f32 to vector<4x30xf32>
    %159 = arith.addf %158, %157 : vector<4x30xf32>
    %160 = arith.divf %158, %159 : vector<4x30xf32>
    %161 = vector.extract_strided_slice %141 {offsets = [0, 60], sizes = [4, 30], strides = [1, 1]} : vector<4x90xf32> to vector<4x30xf32>
    %162 = vector.extract_strided_slice %144 {offsets = [0, 60], sizes = [4, 30], strides = [1, 1]} : vector<4x90xf32> to vector<4x30xf32>
    %163 = arith.mulf %152, %162 : vector<4x30xf32>
    %164 = arith.addf %161, %163 : vector<4x30xf32>
    %165 = math.tanh %164 : vector<4x30xf32>
    %cst_71 = arith.constant 1.000000e+00 : f32
    %166 = vector.broadcast %cst_71 : f32 to vector<4x30xf32>
    %167 = arith.subf %166, %160 : vector<4x30xf32>
    %168 = arith.mulf %167, %165 : vector<4x30xf32>
    %169 = arith.mulf %160, %140 : vector<4x30xf32>
    %170 = arith.addf %168, %169 : vector<4x30xf32>
    %171 = vector.extract_strided_slice %54 {offsets = [8, 0], sizes = [4, 90], strides = [1, 1]} : vector<12x90xf32> to vector<4x90xf32>
    %cst_72 = arith.constant dense<0.000000e+00> : vector<4x90xf32>
    %172 = tpu.matmul %170, %108, %cst_72 {dimension_numbers = #tpu.dot_dimension_numbers<[1], [0], [0], [1], [0, 0, 1, 1], [], []>} : vector<4x30xf32>, vector<30x90xf32>, vector<4x90xf32> -> vector<4x90xf32>
    %173 = vector.broadcast %109 : vector<1x90xf32> to vector<4x90xf32>
    %174 = arith.addf %172, %173 : vector<4x90xf32>
    %175 = vector.extract_strided_slice %171 {offsets = [0, 0], sizes = [4, 30], strides = [1, 1]} : vector<4x90xf32> to vector<4x30xf32>
    %176 = vector.extract_strided_slice %174 {offsets = [0, 0], sizes = [4, 30], strides = [1, 1]} : vector<4x90xf32> to vector<4x30xf32>
    %177 = arith.addf %175, %176 : vector<4x30xf32>
    %178 = arith.negf %177 : vector<4x30xf32>
    %179 = math.exp %178 : vector<4x30xf32>
    %cst_73 = arith.constant 1.000000e+00 : f32
    %180 = vector.broadcast %cst_73 : f32 to vector<4x30xf32>
    %181 = arith.addf %180, %179 : vector<4x30xf32>
    %182 = arith.divf %180, %181 : vector<4x30xf32>
    %183 = vector.extract_strided_slice %171 {offsets = [0, 30], sizes = [4, 30], strides = [1, 1]} : vector<4x90xf32> to vector<4x30xf32>
    %184 = vector.extract_strided_slice %174 {offsets = [0, 30], sizes = [4, 30], strides = [1, 1]} : vector<4x90xf32> to vector<4x30xf32>
    %185 = arith.addf %183, %184 : vector<4x30xf32>
    %186 = arith.negf %185 : vector<4x30xf32>
    %187 = math.exp %186 : vector<4x30xf32>
    %cst_74 = arith.constant 1.000000e+00 : f32
    %188 = vector.broadcast %cst_74 : f32 to vector<4x30xf32>
    %189 = arith.addf %188, %187 : vector<4x30xf32>
    %190 = arith.divf %188, %189 : vector<4x30xf32>
    %191 = vector.extract_strided_slice %171 {offsets = [0, 60], sizes = [4, 30], strides = [1, 1]} : vector<4x90xf32> to vector<4x30xf32>
    %192 = vector.extract_strided_slice %174 {offsets = [0, 60], sizes = [4, 30], strides = [1, 1]} : vector<4x90xf32> to vector<4x30xf32>
    %193 = arith.mulf %182, %192 : vector<4x30xf32>
    %194 = arith.addf %191, %193 : vector<4x30xf32>
    %195 = math.tanh %194 : vector<4x30xf32>
    %cst_75 = arith.constant 1.000000e+00 : f32
    %196 = vector.broadcast %cst_75 : f32 to vector<4x30xf32>
    %197 = arith.subf %196, %190 : vector<4x30xf32>
    %198 = arith.mulf %197, %195 : vector<4x30xf32>
    %199 = arith.mulf %190, %170 : vector<4x30xf32>
    %200 = arith.addf %198, %199 : vector<4x30xf32>
    %c184 = arith.constant 184 : index
    %c0_76 = arith.constant 0 : index
    %201 = vector.load %arg2[%c184, %c0_76] : memref<232x128xf32, #tpu.memory_space<vmem>>, vector<30x90xf32>
    %c216 = arith.constant 216 : index
    %c0_77 = arith.constant 0 : index
    %202 = vector.load %arg2[%c216, %c0_77] : memref<232x128xf32, #tpu.memory_space<vmem>>, vector<1x90xf32>
    %cst_78 = arith.constant 0.000000e+00 : f32
    %203 = vector.broadcast %cst_78 : f32 to vector<4x30xf32>
    %204 = vector.extract_strided_slice %107 {offsets = [0, 0], sizes = [4, 90], strides = [1, 1]} : vector<24x90xf32> to vector<4x90xf32>
    %205 = vector.extract_strided_slice %204 {offsets = [0, 0], sizes = [4, 30], strides = [1, 1]} : vector<4x90xf32> to vector<4x30xf32>
    %206 = vector.extract_strided_slice %202 {offsets = [0, 0], sizes = [1, 30], strides = [1, 1]} : vector<1x90xf32> to vector<1x30xf32>
    %207 = vector.broadcast %206 : vector<1x30xf32> to vector<4x30xf32>
    %208 = arith.addf %205, %207 : vector<4x30xf32>
    %209 = arith.negf %208 : vector<4x30xf32>
    %210 = math.exp %209 : vector<4x30xf32>
    %cst_79 = arith.constant 1.000000e+00 : f32
    %211 = vector.broadcast %cst_79 : f32 to vector<4x30xf32>
    %212 = arith.addf %211, %210 : vector<4x30xf32>
    %213 = arith.divf %211, %212 : vector<4x30xf32>
    %214 = vector.extract_strided_slice %204 {offsets = [0, 30], sizes = [4, 30], strides = [1, 1]} : vector<4x90xf32> to vector<4x30xf32>
    %215 = vector.extract_strided_slice %202 {offsets = [0, 30], sizes = [1, 30], strides = [1, 1]} : vector<1x90xf32> to vector<1x30xf32>
    %216 = vector.broadcast %215 : vector<1x30xf32> to vector<4x30xf32>
    %217 = arith.addf %214, %216 : vector<4x30xf32>
    %218 = arith.negf %217 : vector<4x30xf32>
    %219 = math.exp %218 : vector<4x30xf32>
    %cst_80 = arith.constant 1.000000e+00 : f32
    %220 = vector.broadcast %cst_80 : f32 to vector<4x30xf32>
    %221 = arith.addf %220, %219 : vector<4x30xf32>
    %222 = arith.divf %220, %221 : vector<4x30xf32>
    %223 = vector.extract_strided_slice %204 {offsets = [0, 60], sizes = [4, 30], strides = [1, 1]} : vector<4x90xf32> to vector<4x30xf32>
    %224 = vector.extract_strided_slice %202 {offsets = [0, 60], sizes = [1, 30], strides = [1, 1]} : vector<1x90xf32> to vector<1x30xf32>
    %225 = vector.broadcast %224 : vector<1x30xf32> to vector<4x30xf32>
    %226 = arith.mulf %213, %225 : vector<4x30xf32>
    %227 = arith.addf %223, %226 : vector<4x30xf32>
    %228 = math.tanh %227 : vector<4x30xf32>
    %cst_81 = arith.constant 1.000000e+00 : f32
    %229 = vector.broadcast %cst_81 : f32 to vector<4x30xf32>
    %230 = arith.subf %229, %222 : vector<4x30xf32>
    %231 = arith.mulf %230, %228 : vector<4x30xf32>
    %232 = arith.mulf %222, %203 : vector<4x30xf32>
    %233 = arith.addf %231, %232 : vector<4x30xf32>
    %234 = vector.extract_strided_slice %107 {offsets = [4, 0], sizes = [4, 90], strides = [1, 1]} : vector<24x90xf32> to vector<4x90xf32>
    %cst_82 = arith.constant dense<0.000000e+00> : vector<4x90xf32>
    %235 = tpu.matmul %233, %201, %cst_82 {dimension_numbers = #tpu.dot_dimension_numbers<[1], [0], [0], [1], [0, 0, 1, 1], [], []>} : vector<4x30xf32>, vector<30x90xf32>, vector<4x90xf32> -> vector<4x90xf32>
    %236 = vector.broadcast %202 : vector<1x90xf32> to vector<4x90xf32>
    %237 = arith.addf %235, %236 : vector<4x90xf32>
    %238 = vector.extract_strided_slice %234 {offsets = [0, 0], sizes = [4, 30], strides = [1, 1]} : vector<4x90xf32> to vector<4x30xf32>
    %239 = vector.extract_strided_slice %237 {offsets = [0, 0], sizes = [4, 30], strides = [1, 1]} : vector<4x90xf32> to vector<4x30xf32>
    %240 = arith.addf %238, %239 : vector<4x30xf32>
    %241 = arith.negf %240 : vector<4x30xf32>
    %242 = math.exp %241 : vector<4x30xf32>
    %cst_83 = arith.constant 1.000000e+00 : f32
    %243 = vector.broadcast %cst_83 : f32 to vector<4x30xf32>
    %244 = arith.addf %243, %242 : vector<4x30xf32>
    %245 = arith.divf %243, %244 : vector<4x30xf32>
    %246 = vector.extract_strided_slice %234 {offsets = [0, 30], sizes = [4, 30], strides = [1, 1]} : vector<4x90xf32> to vector<4x30xf32>
    %247 = vector.extract_strided_slice %237 {offsets = [0, 30], sizes = [4, 30], strides = [1, 1]} : vector<4x90xf32> to vector<4x30xf32>
    %248 = arith.addf %246, %247 : vector<4x30xf32>
    %249 = arith.negf %248 : vector<4x30xf32>
    %250 = math.exp %249 : vector<4x30xf32>
    %cst_84 = arith.constant 1.000000e+00 : f32
    %251 = vector.broadcast %cst_84 : f32 to vector<4x30xf32>
    %252 = arith.addf %251, %250 : vector<4x30xf32>
    %253 = arith.divf %251, %252 : vector<4x30xf32>
    %254 = vector.extract_strided_slice %234 {offsets = [0, 60], sizes = [4, 30], strides = [1, 1]} : vector<4x90xf32> to vector<4x30xf32>
    %255 = vector.extract_strided_slice %237 {offsets = [0, 60], sizes = [4, 30], strides = [1, 1]} : vector<4x90xf32> to vector<4x30xf32>
    %256 = arith.mulf %245, %255 : vector<4x30xf32>
    %257 = arith.addf %254, %256 : vector<4x30xf32>
    %258 = math.tanh %257 : vector<4x30xf32>
    %cst_85 = arith.constant 1.000000e+00 : f32
    %259 = vector.broadcast %cst_85 : f32 to vector<4x30xf32>
    %260 = arith.subf %259, %253 : vector<4x30xf32>
    %261 = arith.mulf %260, %258 : vector<4x30xf32>
    %262 = arith.mulf %253, %233 : vector<4x30xf32>
    %263 = arith.addf %261, %262 : vector<4x30xf32>
    %264 = vector.extract_strided_slice %107 {offsets = [8, 0], sizes = [4, 90], strides = [1, 1]} : vector<24x90xf32> to vector<4x90xf32>
    %cst_86 = arith.constant dense<0.000000e+00> : vector<4x90xf32>
    %265 = tpu.matmul %263, %201, %cst_86 {dimension_numbers = #tpu.dot_dimension_numbers<[1], [0], [0], [1], [0, 0, 1, 1], [], []>} : vector<4x30xf32>, vector<30x90xf32>, vector<4x90xf32> -> vector<4x90xf32>
    %266 = vector.broadcast %202 : vector<1x90xf32> to vector<4x90xf32>
    %267 = arith.addf %265, %266 : vector<4x90xf32>
    %268 = vector.extract_strided_slice %264 {offsets = [0, 0], sizes = [4, 30], strides = [1, 1]} : vector<4x90xf32> to vector<4x30xf32>
    %269 = vector.extract_strided_slice %267 {offsets = [0, 0], sizes = [4, 30], strides = [1, 1]} : vector<4x90xf32> to vector<4x30xf32>
    %270 = arith.addf %268, %269 : vector<4x30xf32>
    %271 = arith.negf %270 : vector<4x30xf32>
    %272 = math.exp %271 : vector<4x30xf32>
    %cst_87 = arith.constant 1.000000e+00 : f32
    %273 = vector.broadcast %cst_87 : f32 to vector<4x30xf32>
    %274 = arith.addf %273, %272 : vector<4x30xf32>
    %275 = arith.divf %273, %274 : vector<4x30xf32>
    %276 = vector.extract_strided_slice %264 {offsets = [0, 30], sizes = [4, 30], strides = [1, 1]} : vector<4x90xf32> to vector<4x30xf32>
    %277 = vector.extract_strided_slice %267 {offsets = [0, 30], sizes = [4, 30], strides = [1, 1]} : vector<4x90xf32> to vector<4x30xf32>
    %278 = arith.addf %276, %277 : vector<4x30xf32>
    %279 = arith.negf %278 : vector<4x30xf32>
    %280 = math.exp %279 : vector<4x30xf32>
    %cst_88 = arith.constant 1.000000e+00 : f32
    %281 = vector.broadcast %cst_88 : f32 to vector<4x30xf32>
    %282 = arith.addf %281, %280 : vector<4x30xf32>
    %283 = arith.divf %281, %282 : vector<4x30xf32>
    %284 = vector.extract_strided_slice %264 {offsets = [0, 60], sizes = [4, 30], strides = [1, 1]} : vector<4x90xf32> to vector<4x30xf32>
    %285 = vector.extract_strided_slice %267 {offsets = [0, 60], sizes = [4, 30], strides = [1, 1]} : vector<4x90xf32> to vector<4x30xf32>
    %286 = arith.mulf %275, %285 : vector<4x30xf32>
    %287 = arith.addf %284, %286 : vector<4x30xf32>
    %288 = math.tanh %287 : vector<4x30xf32>
    %cst_89 = arith.constant 1.000000e+00 : f32
    %289 = vector.broadcast %cst_89 : f32 to vector<4x30xf32>
    %290 = arith.subf %289, %283 : vector<4x30xf32>
    %291 = arith.mulf %290, %288 : vector<4x30xf32>
    %292 = arith.mulf %283, %263 : vector<4x30xf32>
    %293 = arith.addf %291, %292 : vector<4x30xf32>
    %294 = vector.extract_strided_slice %107 {offsets = [12, 0], sizes = [4, 90], strides = [1, 1]} : vector<24x90xf32> to vector<4x90xf32>
    %cst_90 = arith.constant dense<0.000000e+00> : vector<4x90xf32>
    %295 = tpu.matmul %293, %201, %cst_90 {dimension_numbers = #tpu.dot_dimension_numbers<[1], [0], [0], [1], [0, 0, 1, 1], [], []>} : vector<4x30xf32>, vector<30x90xf32>, vector<4x90xf32> -> vector<4x90xf32>
    %296 = vector.broadcast %202 : vector<1x90xf32> to vector<4x90xf32>
    %297 = arith.addf %295, %296 : vector<4x90xf32>
    %298 = vector.extract_strided_slice %294 {offsets = [0, 0], sizes = [4, 30], strides = [1, 1]} : vector<4x90xf32> to vector<4x30xf32>
    %299 = vector.extract_strided_slice %297 {offsets = [0, 0], sizes = [4, 30], strides = [1, 1]} : vector<4x90xf32> to vector<4x30xf32>
    %300 = arith.addf %298, %299 : vector<4x30xf32>
    %301 = arith.negf %300 : vector<4x30xf32>
    %302 = math.exp %301 : vector<4x30xf32>
    %cst_91 = arith.constant 1.000000e+00 : f32
    %303 = vector.broadcast %cst_91 : f32 to vector<4x30xf32>
    %304 = arith.addf %303, %302 : vector<4x30xf32>
    %305 = arith.divf %303, %304 : vector<4x30xf32>
    %306 = vector.extract_strided_slice %294 {offsets = [0, 30], sizes = [4, 30], strides = [1, 1]} : vector<4x90xf32> to vector<4x30xf32>
    %307 = vector.extract_strided_slice %297 {offsets = [0, 30], sizes = [4, 30], strides = [1, 1]} : vector<4x90xf32> to vector<4x30xf32>
    %308 = arith.addf %306, %307 : vector<4x30xf32>
    %309 = arith.negf %308 : vector<4x30xf32>
    %310 = math.exp %309 : vector<4x30xf32>
    %cst_92 = arith.constant 1.000000e+00 : f32
    %311 = vector.broadcast %cst_92 : f32 to vector<4x30xf32>
    %312 = arith.addf %311, %310 : vector<4x30xf32>
    %313 = arith.divf %311, %312 : vector<4x30xf32>
    %314 = vector.extract_strided_slice %294 {offsets = [0, 60], sizes = [4, 30], strides = [1, 1]} : vector<4x90xf32> to vector<4x30xf32>
    %315 = vector.extract_strided_slice %297 {offsets = [0, 60], sizes = [4, 30], strides = [1, 1]} : vector<4x90xf32> to vector<4x30xf32>
    %316 = arith.mulf %305, %315 : vector<4x30xf32>
    %317 = arith.addf %314, %316 : vector<4x30xf32>
    %318 = math.tanh %317 : vector<4x30xf32>
    %cst_93 = arith.constant 1.000000e+00 : f32
    %319 = vector.broadcast %cst_93 : f32 to vector<4x30xf32>
    %320 = arith.subf %319, %313 : vector<4x30xf32>
    %321 = arith.mulf %320, %318 : vector<4x30xf32>
    %322 = arith.mulf %313, %293 : vector<4x30xf32>
    %323 = arith.addf %321, %322 : vector<4x30xf32>
    %324 = vector.extract_strided_slice %107 {offsets = [16, 0], sizes = [4, 90], strides = [1, 1]} : vector<24x90xf32> to vector<4x90xf32>
    %cst_94 = arith.constant dense<0.000000e+00> : vector<4x90xf32>
    %325 = tpu.matmul %323, %201, %cst_94 {dimension_numbers = #tpu.dot_dimension_numbers<[1], [0], [0], [1], [0, 0, 1, 1], [], []>} : vector<4x30xf32>, vector<30x90xf32>, vector<4x90xf32> -> vector<4x90xf32>
    %326 = vector.broadcast %202 : vector<1x90xf32> to vector<4x90xf32>
    %327 = arith.addf %325, %326 : vector<4x90xf32>
    %328 = vector.extract_strided_slice %324 {offsets = [0, 0], sizes = [4, 30], strides = [1, 1]} : vector<4x90xf32> to vector<4x30xf32>
    %329 = vector.extract_strided_slice %327 {offsets = [0, 0], sizes = [4, 30], strides = [1, 1]} : vector<4x90xf32> to vector<4x30xf32>
    %330 = arith.addf %328, %329 : vector<4x30xf32>
    %331 = arith.negf %330 : vector<4x30xf32>
    %332 = math.exp %331 : vector<4x30xf32>
    %cst_95 = arith.constant 1.000000e+00 : f32
    %333 = vector.broadcast %cst_95 : f32 to vector<4x30xf32>
    %334 = arith.addf %333, %332 : vector<4x30xf32>
    %335 = arith.divf %333, %334 : vector<4x30xf32>
    %336 = vector.extract_strided_slice %324 {offsets = [0, 30], sizes = [4, 30], strides = [1, 1]} : vector<4x90xf32> to vector<4x30xf32>
    %337 = vector.extract_strided_slice %327 {offsets = [0, 30], sizes = [4, 30], strides = [1, 1]} : vector<4x90xf32> to vector<4x30xf32>
    %338 = arith.addf %336, %337 : vector<4x30xf32>
    %339 = arith.negf %338 : vector<4x30xf32>
    %340 = math.exp %339 : vector<4x30xf32>
    %cst_96 = arith.constant 1.000000e+00 : f32
    %341 = vector.broadcast %cst_96 : f32 to vector<4x30xf32>
    %342 = arith.addf %341, %340 : vector<4x30xf32>
    %343 = arith.divf %341, %342 : vector<4x30xf32>
    %344 = vector.extract_strided_slice %324 {offsets = [0, 60], sizes = [4, 30], strides = [1, 1]} : vector<4x90xf32> to vector<4x30xf32>
    %345 = vector.extract_strided_slice %327 {offsets = [0, 60], sizes = [4, 30], strides = [1, 1]} : vector<4x90xf32> to vector<4x30xf32>
    %346 = arith.mulf %335, %345 : vector<4x30xf32>
    %347 = arith.addf %344, %346 : vector<4x30xf32>
    %348 = math.tanh %347 : vector<4x30xf32>
    %cst_97 = arith.constant 1.000000e+00 : f32
    %349 = vector.broadcast %cst_97 : f32 to vector<4x30xf32>
    %350 = arith.subf %349, %343 : vector<4x30xf32>
    %351 = arith.mulf %350, %348 : vector<4x30xf32>
    %352 = arith.mulf %343, %323 : vector<4x30xf32>
    %353 = arith.addf %351, %352 : vector<4x30xf32>
    %354 = vector.extract_strided_slice %107 {offsets = [20, 0], sizes = [4, 90], strides = [1, 1]} : vector<24x90xf32> to vector<4x90xf32>
    %cst_98 = arith.constant dense<0.000000e+00> : vector<4x90xf32>
    %355 = tpu.matmul %353, %201, %cst_98 {dimension_numbers = #tpu.dot_dimension_numbers<[1], [0], [0], [1], [0, 0, 1, 1], [], []>} : vector<4x30xf32>, vector<30x90xf32>, vector<4x90xf32> -> vector<4x90xf32>
    %356 = vector.broadcast %202 : vector<1x90xf32> to vector<4x90xf32>
    %357 = arith.addf %355, %356 : vector<4x90xf32>
    %358 = vector.extract_strided_slice %354 {offsets = [0, 0], sizes = [4, 30], strides = [1, 1]} : vector<4x90xf32> to vector<4x30xf32>
    %359 = vector.extract_strided_slice %357 {offsets = [0, 0], sizes = [4, 30], strides = [1, 1]} : vector<4x90xf32> to vector<4x30xf32>
    %360 = arith.addf %358, %359 : vector<4x30xf32>
    %361 = arith.negf %360 : vector<4x30xf32>
    %362 = math.exp %361 : vector<4x30xf32>
    %cst_99 = arith.constant 1.000000e+00 : f32
    %363 = vector.broadcast %cst_99 : f32 to vector<4x30xf32>
    %364 = arith.addf %363, %362 : vector<4x30xf32>
    %365 = arith.divf %363, %364 : vector<4x30xf32>
    %366 = vector.extract_strided_slice %354 {offsets = [0, 30], sizes = [4, 30], strides = [1, 1]} : vector<4x90xf32> to vector<4x30xf32>
    %367 = vector.extract_strided_slice %357 {offsets = [0, 30], sizes = [4, 30], strides = [1, 1]} : vector<4x90xf32> to vector<4x30xf32>
    %368 = arith.addf %366, %367 : vector<4x30xf32>
    %369 = arith.negf %368 : vector<4x30xf32>
    %370 = math.exp %369 : vector<4x30xf32>
    %cst_100 = arith.constant 1.000000e+00 : f32
    %371 = vector.broadcast %cst_100 : f32 to vector<4x30xf32>
    %372 = arith.addf %371, %370 : vector<4x30xf32>
    %373 = arith.divf %371, %372 : vector<4x30xf32>
    %374 = vector.extract_strided_slice %354 {offsets = [0, 60], sizes = [4, 30], strides = [1, 1]} : vector<4x90xf32> to vector<4x30xf32>
    %375 = vector.extract_strided_slice %357 {offsets = [0, 60], sizes = [4, 30], strides = [1, 1]} : vector<4x90xf32> to vector<4x30xf32>
    %376 = arith.mulf %365, %375 : vector<4x30xf32>
    %377 = arith.addf %374, %376 : vector<4x30xf32>
    %378 = math.tanh %377 : vector<4x30xf32>
    %cst_101 = arith.constant 1.000000e+00 : f32
    %379 = vector.broadcast %cst_101 : f32 to vector<4x30xf32>
    %380 = arith.subf %379, %373 : vector<4x30xf32>
    %381 = arith.mulf %380, %378 : vector<4x30xf32>
    %382 = arith.mulf %373, %353 : vector<4x30xf32>
    %383 = arith.addf %381, %382 : vector<4x30xf32>
    %c224_102 = arith.constant 224 : index
    %c0_103 = arith.constant 0 : index
    %384 = vector.load %arg2[%c224_102, %c0_103] : memref<232x128xf32, #tpu.memory_space<vmem>>, vector<1x30xf32>
    %c225 = arith.constant 225 : index
    %c0_104 = arith.constant 0 : index
    %385 = vector.load %arg2[%c225, %c0_104] : memref<232x128xf32, #tpu.memory_space<vmem>>, vector<1x30xf32>
    %c226 = arith.constant 226 : index
    %c0_105 = arith.constant 0 : index
    %386 = vector.load %arg2[%c226, %c0_105] : memref<232x128xf32, #tpu.memory_space<vmem>>, vector<1x1xf32>
    %387 = vector.broadcast %384 : vector<1x30xf32> to vector<4x30xf32>
    %388 = arith.mulf %200, %387 : vector<4x30xf32>
    %389 = vector.broadcast %385 : vector<1x30xf32> to vector<4x30xf32>
    %390 = arith.mulf %383, %389 : vector<4x30xf32>
    %391 = arith.addf %388, %390 : vector<4x30xf32>
    %cst_106 = arith.constant dense<0.000000e+00> : vector<4xf32>
    %392 = vector.multi_reduction <add>, %391, %cst_106 [1] : vector<4x30xf32> to vector<4xf32>
    %393 = vector.shape_cast %392 : vector<4xf32> to vector<4x1xf32>
    %394 = vector.broadcast %386 : vector<1x1xf32> to vector<4x1xf32>
    %395 = arith.addf %393, %394 : vector<4x1xf32>
    %c0_107 = arith.constant 0 : index
    %c0_108 = arith.constant 0 : index
    %396 = vector.load %arg3[%c0_107, %c0_108] : memref<4x1xf32, #tpu.memory_space<vmem>>, vector<4x1xf32>
    tpu.vector_store %arg3[%c0_107, %c0_108], %395 {strides = array<i32>} : memref<4x1xf32, #tpu.memory_space<vmem>>, vector<4x1xf32>,
    return
  }
}

</mosaic_0001>

<bundles_post_ra>
// kernel: alphanet_forward.1
= control target key start
LH: loop header
LB: loop body
LE: loop exit
PB: predicated region body
PF: predicated region fallthrough
CT: control target
= control target key end

     0   :  { %vm54_vm0 = vcmask 982016   ;;  %v5080_v24 = vmov 0.0|0.0   ;;  %vm5081_vm1 = vmmov 0   ;;  %v5082_v25 = vmov 0.0   ;;  %s5084_s26 = smov 30   ;;  %s5085_s27 = smov 113   ;;  %s6278_s0 = inlined_call_operand.vmem [shape: f32[120,51], index: 0, kind: input, shape index: {}]   ;;  %s6279_s1 = inlined_call_operand.vmem [shape: f32[440,128], index: 1, kind: input, shape index: {}]   ;;  %s6280_s2 = inlined_call_operand.vmem [shape: f32[232,128], index: 2, kind: input, shape index: {}]   ;;  %s6281_s3 = inlined_call_operand.vmem [shape: f32[4,1], index: 3, kind: output, shape index: {}]  }
   0x1   :  { %v5114_v0 = vld [vmem:[%s6278_s0] sm:$0xff]  ;;  %v5119_v1 = vld [vmem:[%s6278_s0 + $0x8] sm:$0xff]  ;;  %v5124_v2 = vld [vmem:[%s6278_s0 + $0x10] sm:$0xff]  ;;  %4938 = vmatprep.subr.bf16.mxu1 %v5080_v24  ;;  %4034 = vmatprep.mubr.msk.f32.mxu1 %vm5081_vm1, %v5082_v25  ;;  %vm182_vm2 = vcmask 1043456   ;;  %vm5083_vm3 = vmmov 1   ;;  %vm136_vm5 = vcmask 97280  }
   0x2   :  { %v5128_v3 = vpack.c.bf16 %v5119_v1, %v5114_v0  ;;  %v5133_v4 = vld [vmem:[%s6278_s0 + $0x18] sm:$0xff]  ;;  %v5142_v6 = vld [vmem:[%s6278_s0 + $0x20] sm:$0xff]  ;;  %v5147_v7 = vld [vmem:[%s6278_s0 + $0x28] sm:$0xff]  ;;  %s5086_s5 = smov 15   ;;  %vm775_vm6 = vcmask 1046528   ;;  %s5087_s24 = smov 92  }
   0x3   :  { %v5137_v5 = vpack.c.bf16 %v5133_v4, %v5124_v2  ;;  %v5154_v8 = vpack.c.bf16 %v5147_v7, %v5142_v6  ;;  %v29_v9 = vld [vmem:[%s6279_s1] sm:$0xff]  ;;  %v5162_v10 = vld [vmem:[%s6278_s0 + $0x30] sm:$0xff]  ;;  %v5167_v11 = vld [vmem:[%s6278_s0 + $0x38] sm:$0xff]  ;;  %vm770_vm12 = vcmask 121856   ;;  %vm950_vm13 = vcmask 1045504   ;;  %s5088_s23 = smov 68  }
   0x4   :  { %4618 = vmatprep.subr.bf16.mxu0 %v5128_v3  ;;  %4006 = vmatprep.mubr.msk.f32.mxu0 %vm54_vm0, %v29_v9  ;;  %v5174_v12 = vpack.c.bf16 %v5167_v11, %v5162_v10  ;;  %v5179_v13 = vld [vmem:[%s6278_s0 + $0x40] sm:$0xff]  ;;  %v5184_v14 = vld [vmem:[%s6278_s0 + $0x48] sm:$0xff]  ;;  %v5195_v16 = vld [vmem:[%s6278_s0 + $0x50] sm:$0xff]  ;;  %vm1418_vm14 = vcmask 195584   ;;  %s5089_s7 = smov 60   ;;  %s5090_s10 = smov 98  }
   0x5   :  { %4620 = vmatpush3.bf16.msra.mxu0 %v5128_v3  ;;  %v5190_v15 = vpack.c.bf16 %v5184_v14, %v5179_v13  ;;  %v5200_v17 = vld [vmem:[%s6278_s0 + $0x58] sm:$0xff]  ;;  %v5211_v19 = vld [vmem:[%s6278_s0 + $0x60] sm:$0xff]  ;;  %v5216_v20 = vld [vmem:[%s6278_s0 + $0x68] sm:$0xff] }
   0x6   :  { %4622 = vmatprep.subr.bf16.mxu0 %v5137_v5  ;;  %v5206_v18 = vpack.c.bf16 %v5200_v17, %v5195_v16  ;;  %v5222_v21 = vpack.c.bf16 %v5216_v20, %v5211_v19  ;;  %v5229_v22 = vld [vmem:[%s6278_s0 + $0x70] sm:$0xff]  ;;  %v30_v23 = vld [vmem:[%s6279_s1 + $0x8] sm:$0xf]  ;;  %vm4647_vm4 = vmpackc.low %vm182_vm2, %vm5083_vm3 }
   0x7   :  { %v39_v29 = vld [vmem:[%s6279_s1 + $0x50] sm:$0xff]  ;;  %v46_v30 = vld [vmem:[%s6279_s1 + $0x88] sm:$0xff]  ;;  %v40_v31 = vld [vmem:[%s6279_s1 + $0x58] sm:$0xff] }
   0x8   :  { %v47_v32 = vld [vmem:[%s6279_s1 + $0x90] sm:$0xff]  ;;  %v41_v33 = vld [vmem:[%s6279_s1 + $0x60] sm:$0xff]  ;;  %v48_v34 = vld [vmem:[%s6279_s1 + $0x98] sm:$0xff] }
   0x9   :  { %4624 = vmatpush3.bf16.msra.mxu0 %v5137_v5  ;;  %v42_v35 = vld [vmem:[%s6279_s1 + $0x68] sm:$0xff]  ;;  %v49_v36 = vld [vmem:[%s6279_s1 + $0xa0] sm:$0xff]  ;;  %v43_v37 = vld [vmem:[%s6279_s1 + $0x70] sm:$0xff] }
   0xa   :  { %4626 = vmatprep.subr.bf16.mxu0 %v5154_v8  ;;  %v50_v38 = vld [vmem:[%s6279_s1 + $0xa8] sm:$0xff]  ;;  %v44_v39 = vld [vmem:[%s6279_s1 + $0x78] sm:$0xff]  ;;  %v51_v40 = vld [vmem:[%s6279_s1 + $0xb0] sm:$0xff] }
   0xb   :  { %v45_v41 = vld [vmem:[%s6279_s1 + $0x80] sm:$0xff]  ;;  %v52_v42 = vld [vmem:[%s6279_s1 + $0xb8] sm:$0xff]  ;;  %v31_v44 = vld [vmem:[%s6279_s1 + $0x10] sm:$0xff] }
   0xc   :  { %v53_v43 = vld [vmem:[%s6279_s1 + $0xc0] sm:$0xff]  ;;  %vm5488_vm7 = vmpackc.low %vm775_vm6, %vm5083_vm3  ;;  %vm943_vm6 = vcmask 48128  }
   0xd   :  { %4628 = vmatpush3.bf16.msra.mxu0 %v5154_v8 }
   0xe   :  { %4630 = vmatprep.subr.bf16.mxu0 %v5174_v12 }
  0x11   :  { %4632 = vmatpush3.bf16.msra.mxu0 %v5174_v12 }
  0x12   :  { %4634 = vmatprep.subr.bf16.mxu0 %v5190_v15 }
  0x15   :  { %4636 = vmatpush3.bf16.msra.mxu0 %v5190_v15 }
  0x16   :  { %4638 = vmatprep.subr.bf16.mxu0 %v5206_v18 }
  0x19   :  { %4640 = vmatpush3.bf16.msra.mxu0 %v5206_v18 }
  0x1a   :  { %4642 = vmatprep.subr.bf16.mxu0 %v5222_v21 }
  0x1d   :  { %4644 = vmatpush3.bf16.msra.mxu0 %v5222_v21 }
  0x1e   :  { %4004 = vmatprep.subr.mxu0 %v5229_v22 }
  0x21   :  { %4005 = vmatpush3.msra.mxu0 %v5229_v22 }
  0x22   :  { %4007 = vmatmul.mubr.msk.f32.vlgmr.msra.gmra.mrb[0].mxu0 %vm54_vm0, %v30_v23  ;;  %4645 = vmatprep.subr.bf16.mxu0 %v5080_v24 }
  0x23   :  { %4013 = vmatprep.mubr.msk.f32.mxu0 %vm5081_vm1, %v5082_v25 }
  0xf5   :  { %v5244_v26 = vpop.f32.mrb[0].mxu0 }
  0xf6   :  { %v5246_v27 = vpop.f32.mrb[1].mxu0 }
  0xf7   :  { %v4646_v28 = vpack.c.bf16 %v5244_v26, %v5246_v27 }
  0xf9   :  { %4648 = vmatpush3.bf16.msk.msra.mxu0 %vm4647_vm4, %v4646_v28  ;;  %4939 = vmatpush3.bf16.msk.msra.mxu1 %vm4647_vm4, %v4646_v28 }
  0xfa   :  { %4678 = vmatprep.subr.bf16.mxu1 %v5128_v3 }
  0xfc   :  { %4014 = vmatmul.mubr.msk.f32.vlgmr.msra.gmra.mrb[2].mxu0 %vm136_vm5, %v39_v29  ;;  %4035 = vmatmul.mubr.msk.f32.vlgmr.msra.gmra.mrb[0].mxu1 %vm136_vm5, %v46_v30 }
  0xfd   :  { %4016 = vmatprep.mubr.msk.f32.mxu0 %vm5081_vm1, %v5082_v25  ;;  %4037 = vmatprep.mubr.msk.f32.mxu1 %vm5081_vm1, %v5082_v25 }
  0xfe   :  { %4680 = vmatpush3.bf16.msra.mxu1 %v5128_v3 }
  0xff   :  { %4682 = vmatprep.subr.bf16.mxu1 %v5137_v5 }
 0x100   :  { %4017 = vmatmul.mubr.msk.f32.gmra.mrb[4].mxu0 %vm136_vm5, %v40_v31  ;;  %4038 = vmatmul.mubr.msk.f32.gmra.mrb[2].mxu1 %vm136_vm5, %v47_v32 }
 0x101   :  { %4019 = vmatprep.mubr.msk.f32.mxu0 %vm5081_vm1, %v5082_v25  ;;  %4040 = vmatprep.mubr.msk.f32.mxu1 %vm5081_vm1, %v5082_v25 }
 0x102   :  { %4684 = vmatpush3.bf16.msra.mxu1 %v5137_v5 }
 0x103   :  { %4686 = vmatprep.subr.bf16.mxu1 %v5154_v8 }
 0x104   :  { %4020 = vmatmul.mubr.msk.f32.gmra.mrb[6].mxu0 %vm136_vm5, %v41_v33  ;;  %4041 = vmatmul.mubr.msk.f32.gmra.mrb[4].mxu1 %vm136_vm5, %v48_v34 }
 0x105   :  { %4022 = vmatprep.mubr.msk.f32.mxu0 %vm5081_vm1, %v5082_v25  ;;  %4043 = vmatprep.mubr.msk.f32.mxu1 %vm5081_vm1, %v5082_v25 }
 0x106   :  { %4688 = vmatpush3.bf16.msra.mxu1 %v5154_v8 }
 0x107   :  { %4690 = vmatprep.subr.bf16.mxu1 %v5174_v12 }
 0x108   :  { %4023 = vmatmul.mubr.msk.f32.gmra.mrb[8].mxu0 %vm136_vm5, %v42_v35  ;;  %4044 = vmatmul.mubr.msk.f32.gmra.mrb[6].mxu1 %vm136_vm5, %v49_v36 }
 0x109   :  { %4025 = vmatprep.mubr.msk.f32.mxu0 %vm5081_vm1, %v5082_v25  ;;  %4046 = vmatprep.mubr.msk.f32.mxu1 %vm5081_vm1, %v5082_v25 }
 0x10a   :  { %4692 = vmatpush3.bf16.msra.mxu1 %v5174_v12 }
 0x10b   :  { %4694 = vmatprep.subr.bf16.mxu1 %v5190_v15 }
 0x10c   :  { %4026 = vmatmul.mubr.msk.f32.gmra.mrb[10].mxu0 %vm136_vm5, %v43_v37  ;;  %4047 = vmatmul.mubr.msk.f32.gmra.mrb[8].mxu1 %vm136_vm5, %v50_v38 }
 0x10d   :  { %4028 = vmatprep.mubr.msk.f32.mxu0 %vm5081_vm1, %v5082_v25  ;;  %4049 = vmatprep.mubr.msk.f32.mxu1 %vm5081_vm1, %v5082_v25 }
 0x10e   :  { %4696 = vmatpush3.bf16.msra.mxu1 %v5190_v15 }
 0x10f   :  { %4698 = vmatprep.subr.bf16.mxu1 %v5206_v18 }
 0x110   :  { %4029 = vmatmul.mubr.msk.f32.gmra.mrb[12].mxu0 %vm136_vm5, %v44_v39  ;;  %4050 = vmatmul.mubr.msk.f32.gmra.mrb[10].mxu1 %vm136_vm5, %v51_v40 }
 0x111   :  { %4031 = vmatprep.mubr.msk.f32.mxu0 %vm5081_vm1, %v5082_v25  ;;  %4052 = vmatprep.mubr.msk.f32.mxu1 %vm5081_vm1, %v5082_v25 }
 0x112   :  { %4700 = vmatpush3.bf16.msra.mxu1 %v5206_v18 }
 0x113   :  { %4702 = vmatprep.subr.bf16.mxu1 %v5222_v21 }
 0x114   :  { %4032 = vmatmul.mubr.msk.f32.gmra.mrb[14].mxu0 %vm136_vm5, %v45_v41  ;;  %4053 = vmatmul.mubr.msk.f32.gmra.mrb[12].mxu1 %vm136_vm5, %v52_v42 }
 0x115   :  { %4055 = vmatprep.mubr.msk.f32.mxu1 %vm5081_vm1, %v5082_v25  ;;  %4088 = vmatprep.mubr.msk.f32.mxu0 %vm54_vm0, %v31_v44 }
 0x116   :  { %4704 = vmatpush3.bf16.msra.mxu1 %v5222_v21 }
 0x117   :  { %4119 = vmatprep.subr.mxu1 %v5229_v22 }
 0x118   :  { %4056 = vmatmul.mubr.msk.f32.gmra.mrb[14].mxu1 %vm136_vm5, %v53_v43 }
 0x11a   :  { %4120 = vmatpush3.msra.mxu1 %v5229_v22 }
 0x11b   :  { %4734 = vmatprep.subr.bf16.mxu1 %v5128_v3 }
 0x1cf   :  { %v252_v45 = vpop.f32.mrb[2].mxu0  ;;  %v287_v46 = vpop.f32.mrb[0].mxu1 }
 0x1d0   :  { %v4015_v47 = vpop.f32.mrb[3].mxu0  ;;  %v4036_v48 = vpop.f32.mrb[1].mxu1  ;;  %v326_v49 = vsub.f32 %v5114_v0, %v252_v45 }
 0x1d2   :  { %v341_v56 = vmul.f32 %v326_v49, %v326_v49 }
 0x1d3   :  { %v257_v50 = vpop.f32.mrb[4].mxu0  ;;  %v292_v51 = vpop.f32.mrb[2].mxu1 }
 0x1d4   :  { %v327_v52 = vsub.f32 %v5119_v1, %v257_v50  ;;  %v4018_v53 = vpop.f32.mrb[5].mxu0  ;;  %v334_v54 = vsub.f32 %v5179_v13, %v292_v51  ;;  %v4039_v55 = vpop.f32.mrb[3].mxu1  ;;  %v333_v51 = vsub.f32 %v5167_v11, %v287_v46 }
 0x1d6   :  { %v342_v57 = vmul.f32 %v327_v52, %v327_v52  ;;  %v349_v62 = vmul.f32 %v334_v54, %v334_v54 }
 0x1d7   :  { %v262_v58 = vpop.f32.mrb[6].mxu0  ;;  %v297_v59 = vpop.f32.mrb[4].mxu1 }
 0x1d8   :  { %v4649_v60 = vpack.c.bf16 %v342_v57, %v341_v56  ;;  %v4021_v61 = vpop.f32.mrb[7].mxu0  ;;  %v335_v63 = vsub.f32 %v5184_v14, %v297_v59  ;;  %v4042_v9 = vpop.f32.mrb[5].mxu1  ;;  %v328_v0 = vsub.f32 %v5124_v2, %v262_v58 }
 0x1da   :  { %4650 = vmatprep.subr.bf16.mxu0 %v4649_v60  ;;  %v350_v23 = vmul.f32 %v335_v63, %v335_v63  ;;  %v343_v34 = vmul.f32 %v328_v0, %v328_v0 }
 0x1db   :  { %v267_v28 = vpop.f32.mrb[8].mxu0  ;;  %4652 = vmatpush3.bf16.msra.mxu0 %v4649_v60  ;;  %v302_v1 = vpop.f32.mrb[6].mxu1 }
 0x1dc   :  { %v329_v29 = vsub.f32 %v5133_v4, %v267_v28  ;;  %v4024_v30 = vpop.f32.mrb[9].mxu0  ;;  %v4665_v31 = vpack.c.bf16 %v350_v23, %v349_v62  ;;  %v336_v32 = vsub.f32 %v5195_v16, %v302_v1  ;;  %v4045_v33 = vpop.f32.mrb[7].mxu1  ;;  %v32_v23 = vld [vmem:[%s6279_s1 + $0x18] sm:$0xf] }
 0x1dd   :  { %v35_v33 = vld [vmem:[%s6279_s1 + $0x30] sm:$0xff] }
 0x1de   :  { %v344_v35 = vmul.f32 %v329_v29, %v329_v29  ;;  %v351_v40 = vmul.f32 %v336_v32, %v336_v32  ;;  %v34_v32 = vld [vmem:[%s6279_s1 + $0x28] sm:$0xf] }
 0x1df   :  { %v272_v36 = vpop.f32.mrb[10].mxu0  ;;  %v307_v37 = vpop.f32.mrb[8].mxu1 }
 0x1e0   :  { %v4653_v38 = vpack.c.bf16 %v344_v35, %v343_v34  ;;  %v4027_v39 = vpop.f32.mrb[11].mxu0  ;;  %v337_v2 = vsub.f32 %v5200_v17, %v307_v37  ;;  %v4048_v41 = vpop.f32.mrb[9].mxu1  ;;  %v330_v42 = vsub.f32 %v5142_v6, %v272_v36  ;;  %v36_v34 = vld [vmem:[%s6279_s1 + $0x38] sm:$0xf]  ;;  %v37_v35 = vld [vmem:[%s6279_s1 + $0x40] sm:$0xff]  ;;  %v1299_v37 = vld [vmem:[%s6279_s1 + $0xc8] sm:$0xff] }
 0x1e1   :  { %v38_v36 = vld [vmem:[%s6279_s1 + $0x48] sm:$0xf]  ;;  %v1301_v39 = vld [vmem:[%s6279_s1 + $0xd8] sm:$0xff] }
 0x1e2   :  { %4654 = vmatprep.subr.bf16.mxu0 %v4653_v38  ;;  %v352_v43 = vmul.f32 %v337_v2, %v337_v2  ;;  %v345_v52 = vmul.f32 %v330_v42, %v330_v42 }
 0x1e3   :  { %v277_v4 = vpop.f32.mrb[12].mxu0  ;;  %4656 = vmatpush3.bf16.msra.mxu0 %v4653_v38  ;;  %v312_v44 = vpop.f32.mrb[10].mxu1  ;;  %v1300_v38 = vld [vmem:[%s6279_s1 + $0xd0] sm:$0xff] }
 0x1e4   :  { %v331_v45 = vsub.f32 %v5147_v7, %v277_v4  ;;  %v4030_v47 = vpop.f32.mrb[13].mxu0  ;;  %v4669_v48 = vpack.c.bf16 %v352_v43, %v351_v40  ;;  %v338_v49 = vsub.f32 %v5211_v19, %v312_v44  ;;  %v4051_v50 = vpop.f32.mrb[11].mxu1  ;;  %v348_v7 = vmul.f32 %v333_v51, %v333_v51 }
 0x1e5   :  { %v762_v47 = vld [vmem:[%s6280_s2 + $0x10] sm:$0xff] }
 0x1e6   :  { %v346_v53 = vmul.f32 %v331_v45, %v331_v45  ;;  %v353_v58 = vmul.f32 %v338_v49, %v338_v49 }
 0x1e7   :  { %v282_v54 = vpop.f32.mrb[14].mxu0  ;;  %v317_v55 = vpop.f32.mrb[12].mxu1 }
 0x1e8   :  { %v4657_v56 = vpack.c.bf16 %v346_v53, %v345_v52  ;;  %v332_v6 = vsub.f32 %v5162_v10, %v282_v54  ;;  %v4033_v57 = vpop.f32.mrb[15].mxu0  ;;  %v339_v59 = vsub.f32 %v5216_v20, %v317_v55  ;;  %v4054_v60 = vpop.f32.mrb[13].mxu1 }
 0x1ea   :  { %v347_v61 = vmul.f32 %v332_v6, %v332_v6  ;;  %4658 = vmatprep.subr.bf16.mxu0 %v4657_v56  ;;  %v354_v62 = vmul.f32 %v339_v59, %v339_v59 }
 0x1eb   :  { %4660 = vmatpush3.bf16.msra.mxu0 %v4657_v56  ;;  %v322_v63 = vpop.f32.mrb[14].mxu1 }
 0x1ec   :  { %v4661_v9 = vpack.c.bf16 %v348_v7, %v347_v61  ;;  %v4673_v11 = vpack.c.bf16 %v354_v62, %v353_v58  ;;  %v4057_v46 = vpop.f32.mrb[15].mxu1  ;;  %v340_v10 = vsub.f32 %v5229_v22, %v322_v63 }
 0x1ee   :  { %4662 = vmatprep.subr.bf16.mxu0 %v4661_v9  ;;  %v355_v0 = vmul.f32 %v340_v10, %v340_v10 }
 0x1ef   :  { %4664 = vmatpush3.bf16.msra.mxu0 %v4661_v9  ;;  %v760_v9 = vld [vmem:[%s6280_s2] sm:$0xff] }
 0x1f0   :  { %4666 = vmatprep.subr.bf16.mxu0 %v4665_v31 }
 0x1f3   :  { %4668 = vmatpush3.bf16.msra.mxu0 %v4665_v31  ;;  %v33_v31 = vld [vmem:[%s6279_s1 + $0x20] sm:$0xff] }
 0x1f4   :  { %4670 = vmatprep.subr.bf16.mxu0 %v4669_v48  ;;  %4121 = vmatprep.mubr.msk.f32.mxu1 %vm54_vm0, %v33_v31 }
 0x1f5   :  { %4122 = vmatmul.mubr.msk.f32.vlgmr.msra.gmra.mrb[16].mxu1 %vm54_vm0, %v34_v32 }
 0x1f6   :  { %4736 = vmatpush3.bf16.msra.mxu1 %v5128_v3  ;;  %4187 = vmatprep.mubr.msk.f32.mxu1 %vm54_vm0, %v37_v35 }
 0x1f7   :  { %4672 = vmatpush3.bf16.msra.mxu0 %v4669_v48  ;;  %4738 = vmatprep.subr.bf16.mxu1 %v5137_v5  ;;  %v763_v48 = vld [vmem:[%s6280_s2 + $0x18] sm:$0x7f] }
 0x1f8   :  { %4674 = vmatprep.subr.bf16.mxu0 %v4673_v11  ;;  %v4761_v49 = vpack.c.bf16 %v763_v48, %v762_v47 }
 0x1fa   :  { %4740 = vmatpush3.bf16.msra.mxu1 %v5137_v5 }
 0x1fb   :  { %4676 = vmatpush3.bf16.msra.mxu0 %v4673_v11  ;;  %4742 = vmatprep.subr.bf16.mxu1 %v5154_v8  ;;  %v761_v11 = vld [vmem:[%s6280_s2 + $0x8] sm:$0x7f] }
 0x1fc   :  { %4086 = vmatprep.subr.mxu0 %v355_v0  ;;  %v4767_v46 = vpack.c.bf16 %v761_v11, %v760_v9 }
 0x1fe   :  { %4744 = vmatpush3.bf16.msra.mxu1 %v5154_v8 }
 0x1ff   :  { %4087 = vmatpush3.msra.mxu0 %v355_v0  ;;  %4746 = vmatprep.subr.bf16.mxu1 %v5174_v12 }
 0x200   :  { %4089 = vmatmul.mubr.msk.f32.vlgmr.msra.gmra.mrb[16].mxu0 %vm54_vm0, %v32_v23  ;;  %4706 = vmatprep.subr.bf16.mxu0 %v5128_v3 }
 0x201   :  { %4708 = vmatpush3.bf16.msra.mxu0 %v5128_v3  ;;  %4154 = vmatprep.mubr.msk.f32.mxu0 %vm54_vm0, %v35_v33 }
 0x202   :  { %4710 = vmatprep.subr.bf16.mxu0 %v5137_v5  ;;  %4748 = vmatpush3.bf16.msra.mxu1 %v5174_v12 }
 0x203   :  { %4750 = vmatprep.subr.bf16.mxu1 %v5190_v15 }
 0x205   :  { %4712 = vmatpush3.bf16.msra.mxu0 %v5137_v5 }
 0x206   :  { %4714 = vmatprep.subr.bf16.mxu0 %v5154_v8  ;;  %4752 = vmatpush3.bf16.msra.mxu1 %v5190_v15 }
 0x207   :  { %4754 = vmatprep.subr.bf16.mxu1 %v5206_v18 }
 0x209   :  { %4716 = vmatpush3.bf16.msra.mxu0 %v5154_v8 }
 0x20a   :  { %4718 = vmatprep.subr.bf16.mxu0 %v5174_v12  ;;  %4756 = vmatpush3.bf16.msra.mxu1 %v5206_v18 }
 0x20b   :  { %4758 = vmatprep.subr.bf16.mxu1 %v5222_v21 }
 0x20d   :  { %4720 = vmatpush3.bf16.msra.mxu0 %v5174_v12 }
 0x20e   :  { %4722 = vmatprep.subr.bf16.mxu0 %v5190_v15  ;;  %4760 = vmatpush3.bf16.msra.mxu1 %v5222_v21 }
 0x20f   :  { %4185 = vmatprep.subr.mxu1 %v5229_v22 }
 0x211   :  { %4724 = vmatpush3.bf16.msra.mxu0 %v5190_v15 }
 0x212   :  { %4726 = vmatprep.subr.bf16.mxu0 %v5206_v18  ;;  %4186 = vmatpush3.msra.mxu1 %v5229_v22 }
 0x213   :  { %4773 = vmatprep.subr.bf16.mxu1 %v5080_v24  ;;  %4188 = vmatmul.mubr.msk.f32.vlgmr.msra.gmra.mrb[18].mxu1 %vm54_vm0, %v38_v36 }
 0x214   :  { %4775 = vmatpush3.bf16.msra.mxu1 %v5128_v3  ;;  %4254 = vmatprep.mubr.msk.f32.mxu1 %vm5081_vm1, %v5082_v25 }
 0x215   :  { %4728 = vmatpush3.bf16.msra.mxu0 %v5206_v18  ;;  %4776 = vmatprep.subr.bf16.mxu1 %v5080_v24 }
 0x216   :  { %4730 = vmatprep.subr.bf16.mxu0 %v5222_v21 }
 0x218   :  { %4778 = vmatpush3.bf16.msra.mxu1 %v5137_v5 }
 0x219   :  { %4732 = vmatpush3.bf16.msra.mxu0 %v5222_v21  ;;  %4779 = vmatprep.subr.bf16.mxu1 %v5080_v24 }
 0x21a   :  { %4152 = vmatprep.subr.mxu0 %v5229_v22 }
 0x21c   :  { %4781 = vmatpush3.bf16.msra.mxu1 %v5154_v8 }
 0x21d   :  { %4153 = vmatpush3.msra.mxu0 %v5229_v22  ;;  %4782 = vmatprep.subr.bf16.mxu1 %v5080_v24 }
 0x21e   :  { %4155 = vmatmul.mubr.msk.f32.vlgmr.msra.gmra.mrb[18].mxu0 %vm54_vm0, %v36_v34  ;;  %4763 = vmatprep.subr.msk.bf16.mxu0 %vm5488_vm7, %v4761_v49 }
 0x21f   :  { %4766 = vmatpush3.bf16.msk.msra.mxu0 %vm5488_vm7, %v4761_v49 }
 0x220   :  { %4784 = vmatpush3.bf16.msra.mxu1 %v5174_v12  ;;  %4769 = vmatprep.subr.msk.bf16.mxu0 %vm5488_vm7, %v4767_v46 }
 0x221   :  { %4785 = vmatprep.subr.bf16.mxu1 %v5080_v24 }
 0x224   :  { %4787 = vmatpush3.bf16.msra.mxu1 %v5190_v15 }
 0x225   :  { %4788 = vmatprep.subr.bf16.mxu1 %v5080_v24 }
 0x228   :  { %4790 = vmatpush3.bf16.msra.mxu1 %v5206_v18 }
 0x229   :  { %4791 = vmatprep.subr.bf16.mxu1 %v5080_v24 }
 0x22c   :  { %4793 = vmatpush3.bf16.msra.mxu1 %v5222_v21 }
 0x22d   :  { %4252 = vmatprep.subr.mxu1 %v5082_v25 }
 0x230   :  { %4253 = vmatpush3.msra.mxu1 %v5229_v22 }
 0x231   :  { %4255 = vmatmul.mubr.msk.f32.vlgmr.msra.gmra.mrb[20].mxu1 %vm54_vm0, %v1299_v37  ;;  %4940 = vmatprep.subr.bf16.mxu1 %v5080_v24 }
 0x232   :  { %4257 = vmatprep.mubr.msk.f32.mxu1 %vm5081_vm1, %v5082_v25 }
 0x235   :  { %4258 = vmatmul.mubr.msk.f32.gmra.mrb[22].mxu1 %vm54_vm0, %v1300_v38 }
 0x236   :  { %4260 = vmatprep.mubr.msk.f32.mxu1 %vm5081_vm1, %v5082_v25 }
 0x239   :  { %4261 = vmatmul.mubr.msk.f32.gmra.mrb[24].mxu1 %vm54_vm0, %v1301_v39 }
 0x23a   :  { %4293 = vmatprep.mubr.msk.f32.mxu1 %vm5081_vm1, %v5082_v25 }
 0x2c8   :  { %v5516_v0 = vpop.f32.mrb[16].mxu1 }
 0x2c9   :  { %v5518_v23 = vpop.f32.mrb[17].mxu1 }
 0x2d3   :  { %v4090_v28 = vpop.f32.mrb[16].mxu0 }
 0x2d4   :  { %v5393_v1 = vmul.f32 0.11111111, %v4090_v28  ;;  %v428_v29 = vpop.f32.mrb[17].mxu0 }
 0x2d5   :  { %v5395_v30 = vmul.f32 0.11111111, %v428_v29 }
 0x2d6   :  { %710 = vrot.lane.b32.xlu1 %v5393_v1, %s5084_s26  ;;  %vm691_vm4 = vcmp.eq.f32.partialorder %v5393_v1, inf  ;;  %vm693_vm5 = vcmp.eq.f32.partialorder %v5393_v1, 0.0 }
 0x2d7   :  { %726 = vrot.lane.b32.xlu0 %v5395_v30, %s5085_s27  ;;  %vm684_vm15 = vcmp.eq.f32.partialorder %v5395_v30, inf  ;;  %vm686_vm2 = vcmp.eq.f32.partialorder %v5395_v30, 0.0 }
 0x2da   :  { %708 = vrot.lane.b32.xlu1 %v5395_v30, %s5084_s26 }
 0x2db   :  { %728 = vrot.lane.b32.xlu0 %v5393_v1, %s5085_s27 }
 0x2de   :  { %716 = vrot.lane.b32.xlu1 %v5395_v30, %s5086_s5 }
 0x2e2   :  { %718 = vrot.lane.b32.xlu1 %v5393_v1, %s5086_s5 }
 0x2e6   :  { %v4189_v32 = vpop.f32.mrb[18].mxu1 }
 0x2e7   :  { %v673_v36 = vpop.f32.mrb[19].mxu1 }
 0x2f1   :  { %v4156_v28 = vpop.f32.mrb[18].mxu0 }
 0x2f2   :  { %v592_v29 = vpop.f32.mrb[19].mxu0 }
 0x348   :  { %v711_v40 = vpop.permute.xlu1 %710 }
 0x349   :  { %v727_v2 = vpop.permute.xlu0 %726  ;;  %v715_v50 = vsub.f32 %v5393_v1, %v711_v40 }
 0x34a   :  { %v732_v41 = vmul.f32 %v727_v2, %v5395_v30  ;;  %v5528_v2 = vld [vmem:[%s6280_s2 + $0x20] sm:$0x3f] }
 0x34c   :  { %4967 = vrsqrt.f32 %v732_v41  ;;  %v709_v42 = vpop.permute.xlu1 %708  ;;  %vm736_vm8 = vcmp.eq.f32.partialorder %v732_v41, inf  ;;  %v739_v56 = vand.u32 2147483648, %v732_v41  ;;  %vm738_vm9 = vcmp.eq.f32.partialorder %v732_v41, 0.0 }
 0x34d   :  { %v729_v43 = vpop.permute.xlu0 %728  ;;  %v714_v59 = vsub.f32 %v5395_v30, %v709_v42 }
 0x34e   :  { %v733_v4 = vmul.f32 %v729_v43, %v5393_v1 }
 0x350   :  { %4969 = vrsqrt.f32 %v733_v4  ;;  %v717_v45 = vpop.permute.xlu1 %716  ;;  %vm743_vm10 = vcmp.eq.f32.partialorder %v733_v4, inf  ;;  %v746_v7 = vand.u32 2147483648, %v733_v4  ;;  %vm745_vm11 = vcmp.eq.f32.partialorder %v733_v4, 0.0 }
 0x351   :  { %v722_v61 = vsub.f32 %v714_v59, %v717_v45  ;;  %4971 = vrcp.f32 %v4156_v28  ;;  %v5537_v45 = vpop.f32.mrb[20].mxu1 }
 0x352   :  { %4973 = vrcp.f32 %v592_v29  ;;  %v4256_v47 = vpop.f32.mrb[21].mxu1 }
 0x353   :  { %v724_v10 = vmul.f32 0.5, %v722_v61  ;;  %v5539_v48 = vpop.f32.mrb[22].mxu1 }
 0x354   :  { %v719_v51 = vpop.permute.xlu1 %718  ;;  %v5543_v49 = vpack.c.bf16 %v5539_v48, %v5537_v45 }
 0x355   :  { %v723_v52 = vsub.f32 %v715_v50, %v719_v51  ;;  %v4259_v50 = vpop.f32.mrb[23].mxu1 }
 0x356   :  { %v4968_v53 = vpop.eup %4967  ;;  %4942 = vmatpush3.bf16.msra.mxu1 %v5543_v49  ;;  %v5547_v51 = vpop.f32.mrb[24].mxu1 }
 0x357   :  { %v725_v54 = vmul.f32 0.5, %v723_v52  ;;  %v735_v55 = vmul.f32 %v4968_v53, %v732_v41  ;;  %4941 = vmatprep.subr.mxu1 %v5082_v25  ;;  %v4262_v52 = vpop.f32.mrb[25].mxu1  ;;  %v1322_v53 = vld [vmem:[%s6279_s1 + $0x180] sm:$0xff] }
 0x359   :  { %768 = vrot.lane.b32.xlu1 %v725_v54, %s5087_s24  ;;  %v737_v6 = vsel %vm736_vm8, %v732_v41, %v735_v55  ;;  %v1324_v55 = vld [vmem:[%s6279_s1 + $0x190] sm:$0xff] }
 0x35a   :  { %v4970_v57 = vpop.eup %4969  ;;  %v740_v58 = vsel %vm738_vm9, %v739_v56, %v737_v6  ;;  %4943 = vmatpush3.msra.mxu1 %v5547_v51  ;;  %v1325_v56 = vld [vmem:[%s6279_s1 + $0x198] sm:$0xff]  ;;  %v1326_v6 = vld [vmem:[%s6279_s1 + $0x1a0] sm:$0xff] }
 0x35b   :  { %750 = vrot.lane.b32.xlu0 %v740_v58, %s5084_s26  ;;  %v742_v60 = vmul.f32 %v4970_v57, %v733_v4  ;;  %v4972_v31 = vpop.eup %4971  ;;  %4797 = vmatprep.subr.bf16.mxu1 %v5080_v24  ;;  %v1327_v57 = vld [vmem:[%s6279_s1 + $0x1a8] sm:$0xff]  ;;  %v1328_v58 = vld [vmem:[%s6279_s1 + $0x1b0] sm:$0xff] }
 0x35c   :  { %v4974_v33 = vpop.eup %4973  ;;  %v5520_v34 = vmul.f32 %v4972_v31, %v4189_v32  ;;  %4294 = vmatmul.mubr.msk.f32.vlgmr.msra.gmra.mrb[26].mxu1 %vm1418_vm14, %v1322_v53  ;;  %v1118_v32 = vld [vmem:[%s6280_s2 + $0x30] sm:$0x3f] }
 0x35d   :  { %v744_v62 = vsel %vm743_vm10, %v733_v4, %v742_v60  ;;  %v5522_v37 = vmul.f32 %v4974_v33, %v673_v36  ;;  %4296 = vmatprep.mubr.msk.f32.mxu1 %vm5081_vm1, %v5082_v25 }
 0x35e   :  { %v747_v63 = vsel %vm745_vm11, %v746_v7, %v744_v62  ;;  %v687_v62 = vand.u32 2147483648, %v5395_v30 }
 0x35f   :  { %752 = vrot.lane.b32.xlu0 %v747_v63, %s5084_s26  ;;  %v3578_v36 = vadd.f32 -1.0, %v5522_v37  ;;  %v1318_v37 = vld [vmem:[%s6279_s1 + $0x160] sm:$0xff] }
 0x363   :  { %766 = vrot.lane.b32.xlu0 %v724_v10, %s5087_s24 }
 0x3cb   :  { %v769_v40 = vpop.permute.xlu1 %768 }
 0x3cd   :  { %v751_v35 = vpop.permute.xlu0 %750 }
 0x3ce   :  { %4975 = vrcp.f32 %v751_v35 }
 0x3d1   :  { %v753_v38 = vpop.permute.xlu0 %752 }
 0x3d2   :  { %4977 = vrcp.f32 %v753_v38  ;;  %v3579_v38 = vadd.f32 -1.0, %v5520_v34  ;;  %v1317_v34 = vld [vmem:[%s6279_s1 + $0x158] sm:$0xff] }
 0x3d3   :  { %4979 = vrsqrt.f32 %v5395_v30 }
 0x3d4   :  { %4981 = vrsqrt.f32 %v5393_v1 }
 0x3d5   :  { %v767_v39 = vpop.permute.xlu0 %766 }
 0x3d6   :  { %4194 = vmatprep.mubr.msk.f32.mxu0 %vm770_vm12, %v767_v39  ;;  %v1319_v39 = vld [vmem:[%s6279_s1 + $0x168] sm:$0xff] }
 0x3d7   :  { %4195 = vmatmul.mubr.msk.f32.vlgmr.msra.gmra.mrb[20].mxu0 %vm770_vm12, %v769_v40  ;;  %v1320_v40 = vld [vmem:[%s6279_s1 + $0x170] sm:$0xff] }
 0x3d8   :  { %v4976_v41 = vpop.eup %4975  ;;  %4772 = vmatpush3.bf16.msk.msra.mxu0 %vm5488_vm7, %v4767_v46 }
 0x3d9   :  { %v757_v42 = vmul.f32 %v4976_v41, %v724_v10  ;;  %4204 = vmatprep.subr.msk.mxu0 %vm950_vm13, %v5528_v2  ;;  %v694_v10 = vand.u32 2147483648, %v5393_v1 }
 0x3db   :  { %856 = vrot.lane.b32.xlu0 %v757_v42, %s5087_s24 }
 0x3dc   :  { %v4978_v43 = vpop.eup %4977 }
 0x3dd   :  { %v759_v4 = vmul.f32 %v4978_v43, %v725_v54  ;;  %v1323_v54 = vld [vmem:[%s6279_s1 + $0x188] sm:$0xff]  ;;  %v4980_v59 = vpop.eup %4979 }
 0x3de   :  { %4297 = vmatmul.mubr.msk.f32.gmra.mrb[28].mxu1 %vm1418_vm14, %v1323_v54  ;;  %v683_v60 = vmul.f32 %v4980_v59, %v5395_v30  ;;  %v4982_v7 = vpop.eup %4981 }
 0x3df   :  { %858 = vrot.lane.b32.xlu1 %v759_v4, %s5087_s24  ;;  %4299 = vmatprep.mubr.msk.f32.mxu1 %vm5081_vm1, %v5082_v25  ;;  %v690_v9 = vmul.f32 %v4982_v7, %v5393_v1 }
 0x3e0   :  { %v685_v61 = vsel %vm684_vm15, %v5395_v30, %v683_v60  ;;  %v1031_v30 = vld [vmem:[%s6280_s2 + $0x28] sm:$0x3f] }
 0x3e1   :  { %v688_v63 = vsel %vm686_vm2, %v687_v62, %v685_v61  ;;  %v692_v46 = vsel %vm691_vm4, %v5393_v1, %v690_v9 }
 0x3e2   :  { %4300 = vmatmul.mubr.msk.f32.gmra.mrb[30].mxu1 %vm1418_vm14, %v1324_v55  ;;  %4983 = vrcp.f32 %v688_v63  ;;  %v695_v28 = vsel %vm693_vm5, %v694_v10, %v692_v46  ;;  %v5736_v10 = vld [vmem:[%s6280_s2 + $0x40] ss:$0 sm:$0xff] }
 0x3e3   :  { %4302 = vmatprep.mubr.msk.f32.mxu1 %vm5081_vm1, %v5082_v25  ;;  %4985 = vrcp.f32 %v695_v28 }
 0x3e6   :  { %4303 = vmatmul.mubr.msk.f32.gmra.mrb[32].mxu1 %vm1418_vm14, %v1325_v56 }
 0x3e7   :  { %4305 = vmatprep.mubr.msk.f32.mxu1 %vm5081_vm1, %v5082_v25 }
 0x3ea   :  { %4306 = vmatmul.mubr.msk.f32.gmra.mrb[34].mxu1 %vm1418_vm14, %v1326_v6 }
 0x3eb   :  { %4308 = vmatprep.mubr.msk.f32.mxu1 %vm5081_vm1, %v5082_v25 }
 0x3ec   :  { %v4984_v31 = vpop.eup %4983 }
 0x3ed   :  { %v697_v1 = vmul.f32 %v4984_v31, %v5246_v27  ;;  %v4986_v33 = vpop.eup %4985  ;;  %v1205_v27 = vld [vmem:[%s6280_s2 + $0x38] sm:$0x3f]  ;;  %v5071_v31 = vld [vmem:[%s6278_s0] sm:$0xff] }
 0x3ee   :  { %4309 = vmatmul.mubr.msk.f32.gmra.mrb[36].mxu1 %vm1418_vm14, %v1327_v57  ;;  %v699_v35 = vmul.f32 %v4986_v33, %v5244_v26  ;;  %v1314_v26 = vld [vmem:[%s6279_s1 + $0x140] sm:$0xff]  ;;  %v5072_v33 = vld [vmem:[%s6278_s0 + $0x8] sm:$0xff] }
 0x3ef   :  { %4311 = vmatprep.mubr.msk.f32.mxu1 %vm5081_vm1, %v5082_v25 }
 0x3f2   :  { %4312 = vmatmul.mubr.msk.f32.gmra.mrb[38].mxu1 %vm1418_vm14, %v1328_v58 }
 0x3f3   :  { %4344 = vmatprep.mubr.msk.f32.mxu1 %vm5081_vm1, %v5082_v25 }
 0x42f   :  { %v1570_v41 = vpop.f32.mrb[26].mxu1 }
 0x430   :  { %v1612_v42 = vsub.f32 %v5179_v13, %v1570_v41  ;;  %v4295_v43 = vpop.f32.mrb[27].mxu1 }
 0x432   :  { %v5710_v47 = vmul.f32 %v1612_v42, %v1612_v42 }
 0x44d   :  { %v857_v11 = vpop.permute.xlu0 %856 }
 0x44e   :  { %4201 = vmatprep.mubr.msk.f32.mxu0 %vm770_vm12, %v857_v11 }
 0x451   :  { %v859_v29 = vpop.permute.xlu1 %858 }
 0x452   :  { %4202 = vmatmul.mubr.msk.f32.vlgmr.msra.gmra.mrb[20].mxu0 %vm770_vm12, %v859_v29 }
 0x453   :  { %4206 = vmatprep.mubr.msk.f32.mxu0 %vm943_vm6, %v688_v63  ;;  %4205 = vmatpush3.msk.msra.mxu0 %vm950_vm13, %v5528_v2  ;;  %v1321_v2 = vld [vmem:[%s6279_s1 + $0x178] sm:$0xff] }
 0x454   :  { %4209 = vmatprep.subr.msk.mxu0 %vm950_vm13, %v1031_v30 }
 0x45a   :  { %4207 = vmatmul.mubr.msk.f32.vlgmr.msra.gmra.mrb[20].mxu0 %vm943_vm6, %v695_v28 }
 0x45b   :  { %4211 = vmatprep.mubr.msk.f32.mxu0 %vm943_vm6, %v697_v1  ;;  %4210 = vmatpush3.msk.msra.mxu0 %vm950_vm13, %v1031_v30 }
 0x45c   :  { %4214 = vmatprep.subr.msk.mxu0 %vm950_vm13, %v1118_v32 }
 0x462   :  { %4212 = vmatmul.mubr.msk.f32.vlgmr.msra.gmra.mrb[20].mxu0 %vm943_vm6, %v699_v35 }
 0x463   :  { %4216 = vmatprep.mubr.msk.f32.mxu0 %vm943_vm6, %v3578_v36  ;;  %4215 = vmatpush3.msk.msra.mxu0 %vm950_vm13, %v1118_v32 }
 0x464   :  { %4219 = vmatprep.subr.msk.mxu0 %vm950_vm13, %v1205_v27 }
 0x46a   :  { %4217 = vmatmul.mubr.msk.f32.vlgmr.msra.gmra.mrb[20].mxu0 %vm943_vm6, %v3579_v38 }
 0x46b   :  { %4221 = vmatprep.mubr.msk.f32.mxu0 %vm943_vm6, %v5518_v23  ;;  %4220 = vmatpush3.msk.msra.mxu0 %vm950_vm13, %v1205_v27  ;;  %v1316_v23 = vld [vmem:[%s6279_s1 + $0x150] sm:$0xff] }
 0x46c   :  { %4794 = vmatprep.subr.bf16.mxu0 %v5080_v24 }
 0x472   :  { %4222 = vmatmul.mubr.msk.f32.vlgmr.msra.gmra.mrb[20].mxu0 %vm943_vm6, %v5516_v0  ;;  %v1315_v0 = vld [vmem:[%s6279_s1 + $0x148] sm:$0xff] }
 0x473   :  { %4796 = vmatpush3.bf16.msra.mxu0 %v5543_v49  ;;  %4269 = vmatprep.mubr.msk.f32.mxu0 %vm5081_vm1, %v5082_v25 }
 0x474   :  { %4267 = vmatprep.subr.mxu0 %v5082_v25 }
 0x477   :  { %4268 = vmatpush3.msra.mxu0 %v5547_v51 }
 0x478   :  { %4270 = vmatmul.mubr.msk.f32.vlgmr.msra.gmra.mrb[22].mxu0 %vm1418_vm14, %v1314_v26  ;;  %4818 = vmatprep.subr.bf16.mxu0 %v5080_v24 }
 0x479   :  { %4272 = vmatprep.mubr.msk.f32.mxu0 %vm5081_vm1, %v5082_v25  ;;  %4820 = vmatpush3.bf16.msra.mxu0 %v5128_v3 }
 0x47a   :  { %4821 = vmatprep.subr.bf16.mxu0 %v5080_v24 }
 0x47c   :  { %4273 = vmatmul.mubr.msk.f32.gmra.mrb[24].mxu0 %vm1418_vm14, %v1315_v0 }
 0x47d   :  { %4275 = vmatprep.mubr.msk.f32.mxu0 %vm5081_vm1, %v5082_v25  ;;  %4823 = vmatpush3.bf16.msra.mxu0 %v5137_v5 }
 0x47e   :  { %4824 = vmatprep.subr.bf16.mxu0 %v5080_v24 }
 0x480   :  { %4276 = vmatmul.mubr.msk.f32.gmra.mrb[26].mxu0 %vm1418_vm14, %v1316_v23 }
 0x481   :  { %4278 = vmatprep.mubr.msk.f32.mxu0 %vm5081_vm1, %v5082_v25  ;;  %4826 = vmatpush3.bf16.msra.mxu0 %v5154_v8 }
 0x482   :  { %4827 = vmatprep.subr.bf16.mxu0 %v5080_v24 }
 0x484   :  { %4279 = vmatmul.mubr.msk.f32.gmra.mrb[28].mxu0 %vm1418_vm14, %v1317_v34  ;;  %v5073_v34 = vld [vmem:[%s6278_s0 + $0x10] sm:$0xff] }
 0x485   :  { %4281 = vmatprep.mubr.msk.f32.mxu0 %vm5081_vm1, %v5082_v25  ;;  %4829 = vmatpush3.bf16.msra.mxu0 %v5174_v12 }
 0x486   :  { %4830 = vmatprep.subr.bf16.mxu0 %v5080_v24 }
 0x488   :  { %4282 = vmatmul.mubr.msk.f32.gmra.mrb[30].mxu0 %vm1418_vm14, %v1318_v37 }
 0x489   :  { %4284 = vmatprep.mubr.msk.f32.mxu0 %vm5081_vm1, %v5082_v25  ;;  %4832 = vmatpush3.bf16.msra.mxu0 %v5190_v15 }
 0x48a   :  { %4833 = vmatprep.subr.bf16.mxu0 %v5080_v24 }
 0x48c   :  { %4285 = vmatmul.mubr.msk.f32.gmra.mrb[32].mxu0 %vm1418_vm14, %v1319_v39 }
 0x48d   :  { %4287 = vmatprep.mubr.msk.f32.mxu0 %vm5081_vm1, %v5082_v25  ;;  %4835 = vmatpush3.bf16.msra.mxu0 %v5206_v18 }
 0x48e   :  { %4836 = vmatprep.subr.bf16.mxu0 %v5080_v24 }
 0x490   :  { %4288 = vmatmul.mubr.msk.f32.gmra.mrb[34].mxu0 %vm1418_vm14, %v1320_v40  ;;  %v5074_v40 = vld [vmem:[%s6278_s0 + $0x18] sm:$0xff] }
 0x491   :  { %4290 = vmatprep.mubr.msk.f32.mxu0 %vm5081_vm1, %v5082_v25  ;;  %4838 = vmatpush3.bf16.msra.mxu0 %v5222_v21 }
 0x492   :  { %4381 = vmatprep.subr.mxu0 %v5082_v25 }
 0x494   :  { %4291 = vmatmul.mubr.msk.f32.gmra.mrb[36].mxu0 %vm1418_vm14, %v1321_v2 }
 0x495   :  { %4382 = vmatpush3.msra.mxu0 %v5229_v22  ;;  %4383 = vmatprep.mubr.msk.f32.mxu0 %vm5081_vm1, %v5082_v25 }
 0x496   :  { %4860 = vmatprep.subr.bf16.mxu0 %v5080_v24 }
 0x4b1   :  { %v1575_v4 = vpop.f32.mrb[28].mxu1 }
 0x4b2   :  { %v1613_v49 = vsub.f32 %v5184_v14, %v1575_v4  ;;  %v4298_v50 = vpop.f32.mrb[29].mxu1 }
 0x4b4   :  { %v5713_v52 = vmul.f32 %v1613_v49, %v1613_v49 }
 0x4b5   :  { %v1580_v53 = vpop.f32.mrb[30].mxu1 }
 0x4b6   :  { %v4810_v22 = vpack.c.bf16 %v5713_v52, %v5710_v47  ;;  %v1614_v54 = vsub.f32 %v5195_v16, %v1580_v53  ;;  %v4301_v55 = vpop.f32.mrb[31].mxu1  ;;  %v5075_v53 = vld [vmem:[%s6278_s0 + $0x20] sm:$0xff]  ;;  %v1303_v52 = vld [vmem:[%s6279_s1 + $0xe8] sm:$0xff] }
 0x4b7   :  { %v1302_v47 = vld [vmem:[%s6279_s1 + $0xe0] sm:$0xff] }
 0x4b8   :  { %v5718_v6 = vmul.f32 %v1614_v54, %v1614_v54 }
 0x4b9   :  { %v1585_v56 = vpop.f32.mrb[32].mxu1 }
 0x4ba   :  { %v1615_v13 = vsub.f32 %v5200_v17, %v1585_v56  ;;  %v4304_v57 = vpop.f32.mrb[33].mxu1  ;;  %v5076_v56 = vld [vmem:[%s6278_s0 + $0x28] sm:$0xff] }
 0x4bc   :  { %v5721_v58 = vmul.f32 %v1615_v13, %v1615_v13 }
 0x4bd   :  { %v1590_v59 = vpop.f32.mrb[34].mxu1 }
 0x4be   :  { %v4813_v14 = vpack.c.bf16 %v5721_v58, %v5718_v6  ;;  %v1616_v60 = vsub.f32 %v5211_v19, %v1590_v59  ;;  %v4307_v7 = vpop.f32.mrb[35].mxu1 }
 0x4c0   :  { %v5726_v62 = vmul.f32 %v1616_v60, %v1616_v60 }
 0x4c1   :  { %v1595_v61 = vpop.f32.mrb[36].mxu1 }
 0x4c2   :  { %v1617_v16 = vsub.f32 %v5216_v20, %v1595_v61  ;;  %v4310_v63 = vpop.f32.mrb[37].mxu1 }
 0x4c3   :  { %v5077_v63 = vld [vmem:[%s6278_s0 + $0x30] sm:$0xff] }
 0x4c4   :  { %v5729_v9 = vmul.f32 %v1617_v16, %v1617_v16 }
 0x4c5   :  { %v1600_v11 = vpop.f32.mrb[38].mxu1 }
 0x4c6   :  { %v4816_v17 = vpack.c.bf16 %v5729_v9, %v5726_v62  ;;  %v4313_v46 = vpop.f32.mrb[39].mxu1 }
 0x545   :  { %v4223_v19 = vpop.f32.mrb[20].mxu0 }
 0x546   :  { %v5739_v28 = vadd.f32 %v4223_v19, %v5736_v10  ;;  %v5741_v29 = vpop.f32.mrb[21].mxu0 }
 0x54b   :  { %v1530_v20 = vpop.f32.mrb[22].mxu0 }
 0x54c   :  { %v4271_v30 = vpop.f32.mrb[23].mxu0  ;;  %v1604_v1 = vsub.f32 %v5071_v31, %v1530_v20  ;;  %v5078_v20 = vld [vmem:[%s6278_s0 + $0x38] sm:$0xff] }
 0x54e   :  { %v1619_v27 = vmul.f32 %v1604_v1, %v1604_v1 }
 0x54f   :  { %v1535_v32 = vpop.f32.mrb[24].mxu0 }
 0x550   :  { %v1605_v35 = vsub.f32 %v5072_v33, %v1535_v32  ;;  %v4274_v36 = vpop.f32.mrb[25].mxu0 }
 0x552   :  { %v1620_v38 = vmul.f32 %v1605_v35, %v1605_v35  ;;  %v5781_v35 = vld [vmem:[%s6278_s0 + $0x70] sm:$0xff] }
 0x553   :  { %v1540_v26 = vpop.f32.mrb[26].mxu0  ;;  %v1618_v36 = vsub.f32 %v5781_v35, %v1600_v11 }
 0x554   :  { %v4798_v0 = vpack.c.bf16 %v1620_v38, %v1619_v27  ;;  %v4277_v23 = vpop.f32.mrb[27].mxu0  ;;  %v1606_v37 = vsub.f32 %v5073_v34, %v1540_v26  ;;  %v1306_v34 = vld [vmem:[%s6279_s1 + $0x100] sm:$0xff] }
 0x555   :  { %v1633_v27 = vmul.f32 %v1618_v36, %v1618_v36  ;;  %v1308_v23 = vld [vmem:[%s6279_s1 + $0x110] sm:$0xff] }
 0x556   :  { %4799 = vmatpush3.bf16.msra.mxu1 %v4798_v0  ;;  %v1621_v42 = vmul.f32 %v1606_v37, %v1606_v37  ;;  %v1305_v0 = vld [vmem:[%s6279_s1 + $0xf8] sm:$0xff] }
 0x557   :  { %v1545_v39 = vpop.f32.mrb[28].mxu0  ;;  %4800 = vmatprep.subr.bf16.mxu1 %v5080_v24  ;;  %4384 = vmatmul.mubr.msk.f32.vlgmr.msra.gmra.mrb[38].mxu0 %vm54_vm0, %v1305_v0  ;;  %v1309_v37 = vld [vmem:[%s6279_s1 + $0x118] sm:$0xff] }
 0x558   :  { %v1607_v2 = vsub.f32 %v5074_v40, %v1545_v39  ;;  %v4280_v41 = vpop.f32.mrb[29].mxu0  ;;  %4862 = vmatpush3.bf16.msra.mxu0 %v5128_v3  ;;  %4386 = vmatprep.mubr.msk.f32.mxu0 %vm5081_vm1, %v5082_v25  ;;  %v1310_v39 = vld [vmem:[%s6279_s1 + $0x120] sm:$0xff] }
 0x559   :  { %4863 = vmatprep.subr.bf16.mxu0 %v5080_v24  ;;  %v2112_v40 = vld [vmem:[%s6280_s2 + $0x80] sm:$0xff] }
 0x55a   :  { %v1622_v43 = vmul.f32 %v1607_v2, %v1607_v2  ;;  %v2113_v2 = vld [vmem:[%s6280_s2 + $0x88] sm:$0x7f] }
 0x55b   :  { %v1550_v4 = vpop.f32.mrb[30].mxu0  ;;  %4387 = vmatmul.mubr.msk.f32.gmra.mrb[40].mxu0 %vm54_vm0, %v1306_v34 }
 0x55c   :  { %v4801_v49 = vpack.c.bf16 %v1622_v43, %v1621_v42  ;;  %v4283_v50 = vpop.f32.mrb[31].mxu0  ;;  %v1608_v54 = vsub.f32 %v5075_v53, %v1550_v4  ;;  %4865 = vmatpush3.bf16.msra.mxu0 %v5137_v5  ;;  %4389 = vmatprep.mubr.msk.f32.mxu0 %vm5081_vm1, %v5082_v25  ;;  %v4882_v42 = vpack.c.bf16 %v2113_v2, %v2112_v40 }
 0x55d   :  { %4866 = vmatprep.subr.bf16.mxu0 %v5080_v24 }
 0x55e   :  { %4802 = vmatpush3.bf16.msra.mxu1 %v4801_v49  ;;  %v1623_v59 = vmul.f32 %v1608_v54, %v1608_v54 }
 0x55f   :  { %v1555_v55 = vpop.f32.mrb[32].mxu0  ;;  %4803 = vmatprep.subr.bf16.mxu1 %v5080_v24 }
 0x560   :  { %v1609_v13 = vsub.f32 %v5076_v56, %v1555_v55  ;;  %v4286_v57 = vpop.f32.mrb[33].mxu0  ;;  %4868 = vmatpush3.bf16.msra.mxu0 %v5154_v8 }
 0x561   :  { %4869 = vmatprep.subr.bf16.mxu0 %v5080_v24 }
 0x562   :  { %v1624_v60 = vmul.f32 %v1609_v13, %v1609_v13 }
 0x563   :  { %v1560_v7 = vpop.f32.mrb[34].mxu0 }
 0x564   :  { %v4804_v61 = vpack.c.bf16 %v1624_v60, %v1623_v59  ;;  %v4289_v16 = vpop.f32.mrb[35].mxu0  ;;  %v1610_v46 = vsub.f32 %v5077_v63, %v1560_v7  ;;  %4871 = vmatpush3.bf16.msra.mxu0 %v5174_v12 }
 0x565   :  { %4872 = vmatprep.subr.bf16.mxu0 %v5080_v24 }
 0x566   :  { %4805 = vmatpush3.bf16.msra.mxu1 %v4804_v61  ;;  %v1625_v1 = vmul.f32 %v1610_v46, %v1610_v46 }
 0x567   :  { %v1565_v19 = vpop.f32.mrb[36].mxu0  ;;  %4806 = vmatprep.subr.bf16.mxu1 %v5080_v24 }
 0x568   :  { %v1611_v30 = vsub.f32 %v5078_v20, %v1565_v19  ;;  %v4292_v31 = vpop.f32.mrb[37].mxu0  ;;  %4874 = vmatpush3.bf16.msra.mxu0 %v5190_v15 }
 0x569   :  { %4875 = vmatprep.subr.bf16.mxu0 %v5080_v24 }
 0x56a   :  { %v1626_v32 = vmul.f32 %v1611_v30, %v1611_v30 }
 0x56c   :  { %v4807_v33 = vpack.c.bf16 %v1626_v32, %v1625_v1  ;;  %4877 = vmatpush3.bf16.msra.mxu0 %v5206_v18 }
 0x56d   :  { %4878 = vmatprep.subr.bf16.mxu0 %v5080_v24 }
 0x56e   :  { %4808 = vmatpush3.bf16.msra.mxu1 %v4807_v33 }
 0x56f   :  { %4809 = vmatprep.subr.bf16.mxu1 %v5080_v24 }
 0x570   :  { %4880 = vmatpush3.bf16.msra.mxu0 %v5222_v21 }
 0x571   :  { %4459 = vmatprep.subr.mxu0 %v5082_v25 }
 0x572   :  { %4811 = vmatpush3.bf16.msra.mxu1 %v4810_v22  ;;  %v1304_v22 = vld [vmem:[%s6279_s1 + $0xf0] sm:$0xff] }
 0x573   :  { %4812 = vmatprep.subr.bf16.mxu1 %v5080_v24 }
 0x574   :  { %4460 = vmatpush3.msra.mxu0 %v5781_v35 }
 0x575   :  { %4881 = vmatprep.subr.bf16.mxu0 %v5080_v24 }
 0x576   :  { %4814 = vmatpush3.bf16.msra.mxu1 %v4813_v14 }
 0x577   :  { %4815 = vmatprep.subr.bf16.mxu1 %v5080_v24 }
 0x57a   :  { %4817 = vmatpush3.bf16.msra.mxu1 %v4816_v17 }
 0x57b   :  { %4342 = vmatprep.subr.mxu1 %v5082_v25 }
 0x57e   :  { %4343 = vmatpush3.msra.mxu1 %v1633_v27 }
 0x57f   :  { %4345 = vmatmul.mubr.msk.f32.vlgmr.msra.gmra.mrb[40].mxu1 %vm54_vm0, %v1302_v47  ;;  %4839 = vmatprep.subr.bf16.mxu1 %v5080_v24  ;;  %v2110_v47 = vld [vmem:[%s6280_s2 + $0x70] sm:$0xff] }
 0x580   :  { %4347 = vmatprep.mubr.msk.f32.mxu1 %vm5081_vm1, %v5082_v25  ;;  %4841 = vmatpush3.bf16.msra.mxu1 %v5128_v3  ;;  %v1307_v3 = vld [vmem:[%s6279_s1 + $0x108] sm:$0xff] }
 0x581   :  { %4842 = vmatprep.subr.bf16.mxu1 %v5080_v24  ;;  %4390 = vmatmul.mubr.msk.f32.gmra.mrb[42].mxu0 %vm54_vm0, %v1307_v3 }
 0x582   :  { %4461 = vmatprep.mubr.msk.f32.mxu0 %vm5081_vm1, %v5082_v25 }
 0x583   :  { %4348 = vmatmul.mubr.msk.f32.gmra.mrb[42].mxu1 %vm54_vm0, %v1303_v52  ;;  %v2111_v52 = vld [vmem:[%s6280_s2 + $0x78] sm:$0x7f] }
 0x584   :  { %4350 = vmatprep.mubr.msk.f32.mxu1 %vm5081_vm1, %v5082_v25  ;;  %4844 = vmatpush3.bf16.msra.mxu1 %v5137_v5  ;;  %v1311_v5 = vld [vmem:[%s6279_s1 + $0x128] sm:$0xff] }
 0x585   :  { %4845 = vmatprep.subr.bf16.mxu1 %v5080_v24  ;;  %4462 = vmatmul.mubr.msk.f32.vlgmr.msra.gmra.mrb[44].mxu0 %vm54_vm0, %v1311_v5 }
 0x586   :  { %4464 = vmatprep.mubr.msk.f32.mxu0 %vm5081_vm1, %v5082_v25  ;;  %4884 = vmatpush3.bf16.msk.msra.mxu0 %vm5488_vm7, %v4882_v42 }
 0x587   :  { %4351 = vmatmul.mubr.msk.f32.gmra.mrb[44].mxu1 %vm54_vm0, %v1304_v22  ;;  %4507 = vmatprep.subr.mxu0 %v5082_v25 }
 0x588   :  { %4847 = vmatpush3.bf16.msra.mxu1 %v5154_v8  ;;  %4422 = vmatprep.mubr.msk.f32.mxu1 %vm5081_vm1, %v5082_v25  ;;  %v1312_v8 = vld [vmem:[%s6279_s1 + $0x130] sm:$0xff] }
 0x589   :  { %4848 = vmatprep.subr.bf16.mxu1 %v5080_v24  ;;  %4465 = vmatmul.mubr.msk.f32.gmra.mrb[46].mxu0 %vm54_vm0, %v1312_v8 }
 0x58a   :  { %4467 = vmatprep.mubr.msk.f32.mxu0 %vm5081_vm1, %v5082_v25 }
 0x58c   :  { %4850 = vmatpush3.bf16.msra.mxu1 %v5174_v12  ;;  %v1313_v12 = vld [vmem:[%s6279_s1 + $0x138] sm:$0xff] }
 0x58d   :  { %4851 = vmatprep.subr.bf16.mxu1 %v5080_v24  ;;  %4468 = vmatmul.mubr.msk.f32.gmra.mrb[48].mxu0 %vm54_vm0, %v1313_v12 }
 0x58e   :  { %4474 = vmatprep.mubr.msk.f32.mxu0 %vm5081_vm1, %v5082_v25 }
 0x590   :  { %4853 = vmatpush3.bf16.msra.mxu1 %v5190_v15 }
 0x591   :  { %4854 = vmatprep.subr.bf16.mxu1 %v5080_v24 }
 0x594   :  { %4856 = vmatpush3.bf16.msra.mxu1 %v5206_v18 }
 0x595   :  { %4857 = vmatprep.subr.bf16.mxu1 %v5080_v24 }
 0x598   :  { %4859 = vmatpush3.bf16.msra.mxu1 %v5222_v21 }
 0x599   :  { %4420 = vmatprep.subr.mxu1 %v5082_v25 }
 0x59c   :  { %4421 = vmatpush3.msra.mxu1 %v5781_v35 }
 0x59d   :  { %4944 = vmatprep.subr.bf16.mxu1 %v5080_v24  ;;  %4423 = vmatmul.mubr.msk.f32.vlgmr.msra.gmra.mrb[46].mxu1 %vm54_vm0, %v1308_v23 }
 0x59e   :  { %4425 = vmatprep.mubr.msk.f32.mxu1 %vm5081_vm1, %v5082_v25  ;;  %4945 = vmatpush3.bf16.msk.msra.mxu1 %vm5488_vm7, %v4882_v42 }
 0x59f   :  { %4885 = vmatprep.subr.bf16.mxu1 %v5080_v24 }
 0x5a1   :  { %4426 = vmatmul.mubr.msk.f32.gmra.mrb[48].mxu1 %vm54_vm0, %v1309_v37 }
 0x5a2   :  { %4428 = vmatprep.mubr.msk.f32.mxu1 %vm5081_vm1, %v5082_v25 }
 0x5a5   :  { %4429 = vmatmul.mubr.msk.f32.gmra.mrb[50].mxu1 %vm54_vm0, %v1310_v39 }
 0x5a6   :  { %4480 = vmatprep.mubr.msk.f32.mxu1 %vm5081_vm1, %v5082_v25 }
 0x62a   :  { %v5938_v33 = vpop.f32.mrb[38].mxu0 }
 0x62b   :  { %v4385_v35 = vpop.f32.mrb[39].mxu0 }
 0x62e   :  { %v5954_v8 = vpop.f32.mrb[40].mxu0 }
 0x62f   :  { %v4388_v12 = vpop.f32.mrb[41].mxu0 }
 0x652   :  { %v1709_v6 = vpop.f32.mrb[40].mxu1 }
 0x653   :  { %v5824_v58 = vmul.f32 0.25, %v1709_v6  ;;  %v4346_v14 = vpop.f32.mrb[41].mxu1  ;;  %v4886_v6 = vpack.c.bf16 %v2111_v52, %v2110_v47 }
 0x654   :  { %v5957_v2 = vpop.f32.mrb[42].mxu0 }
 0x655   :  { %2059 = vrot.lane.b32.xlu0 %v5824_v58, %s5085_s27  ;;  %vm1997_vm15 = vcmp.eq.f32.partialorder %v5824_v58, 0.0 }
 0x656   :  { %v1714_v62 = vpop.f32.mrb[42].mxu1 }
 0x657   :  { %v5828_v9 = vmul.f32 0.25, %v1714_v62  ;;  %v4349_v17 = vpop.f32.mrb[43].mxu1 }
 0x659   :  { %2061 = vrot.lane.b32.xlu1 %v5828_v9, %s5085_s27  ;;  %vm2002_vm2 = vcmp.eq.f32.partialorder %v5828_v9, inf  ;;  %vm2004_vm4 = vcmp.eq.f32.partialorder %v5828_v9, 0.0 }
 0x65a   :  { %v1719_v11 = vpop.f32.mrb[44].mxu1 }
 0x65b   :  { %v5832_v38 = vmul.f32 0.25, %v1719_v11  ;;  %v4352_v26 = vpop.f32.mrb[45].mxu1 }
 0x65d   :  { %2063 = vrot.lane.b32.xlu0 %v5832_v38, %s5085_s27  ;;  %2048 = vrot.lane.b32.xlu1 %v5832_v38, %s5086_s5  ;;  %vm2009_vm5 = vcmp.eq.f32.partialorder %v5832_v38, inf }
 0x661   :  { %2032 = vrot.lane.b32.xlu0 %v5824_v58, %s5084_s26 }
 0x665   :  { %2036 = vrot.lane.b32.xlu0 %v5832_v38, %s5084_s26 }
 0x669   :  { %2044 = vrot.lane.b32.xlu0 %v5824_v58, %s5086_s5 }
 0x66d   :  { %2034 = vrot.lane.b32.xlu0 %v5828_v9, %s5084_s26 }
 0x670   :  { %v1890_v0 = vpop.f32.mrb[46].mxu1 }
 0x671   :  { %v4424_v34 = vpop.f32.mrb[47].mxu1 }
 0x6c7   :  { %v2060_v15 = vpop.permute.xlu0 %2059 }
 0x6c8   :  { %v2068_v18 = vmul.f32 %v2060_v15, %v5824_v58  ;;  %v1895_v15 = vpop.f32.mrb[48].mxu1 }
 0x6c9   :  { %v4427_v40 = vpop.f32.mrb[49].mxu1 }
 0x6ca   :  { %4987 = vrsqrt.f32 %v2068_v18  ;;  %vm2073_vm0 = vcmp.eq.f32.partialorder %v2068_v18, inf  ;;  %v2076_v54 = vand.u32 2147483648, %v2068_v18  ;;  %vm2075_vm8 = vcmp.eq.f32.partialorder %v2068_v18, 0.0  ;;  %v1900_v42 = vpop.f32.mrb[50].mxu1 }
 0x6cb   :  { %v2062_v21 = vpop.permute.xlu1 %2061 }
 0x6cc   :  { %v2069_v41 = vmul.f32 %v2062_v21, %v5828_v9 }
 0x6ce   :  { %4989 = vrsqrt.f32 %v2069_v41  ;;  %vm2080_vm9 = vcmp.eq.f32.partialorder %v2069_v41, inf  ;;  %v2083_v16 = vand.u32 2147483648, %v2069_v41  ;;  %vm2082_vm10 = vcmp.eq.f32.partialorder %v2069_v41, 0.0 }
 0x6cf   :  { %v2064_v43 = vpop.permute.xlu0 %2063  ;;  %v2049_v60 = vpop.permute.xlu1 %2048 }
 0x6d0   :  { %v2070_v4 = vmul.f32 %v2064_v43, %v5832_v38  ;;  %v4391_v43 = vpop.f32.mrb[43].mxu0 }
 0x6d2   :  { %4991 = vrsqrt.f32 %v2070_v4  ;;  %vm2087_vm11 = vcmp.eq.f32.partialorder %v2070_v4, inf  ;;  %v2090_v31 = vand.u32 2147483648, %v2070_v4  ;;  %vm2089_vm14 = vcmp.eq.f32.partialorder %v2070_v4, 0.0 }
 0x6d3   :  { %v2033_v49 = vpop.permute.xlu0 %2032 }
 0x6d4   :  { %v4988_v50 = vpop.eup %4987  ;;  %v2041_v14 = vsub.f32 %v5824_v58, %v2033_v49  ;;  %v4430_v49 = vpop.f32.mrb[51].mxu1 }
 0x6d5   :  { %v2072_v53 = vmul.f32 %v4988_v50, %v2068_v18 }
 0x6d7   :  { %v2037_v55 = vpop.permute.xlu0 %2036  ;;  %v2074_v56 = vsel %vm2073_vm0, %v2068_v18, %v2072_v53  ;;  %vm2011_vm0 = vcmp.eq.f32.partialorder %v5832_v38, 0.0 }
 0x6d8   :  { %v4990_v13 = vpop.eup %4989  ;;  %v2043_v57 = vsub.f32 %v5832_v38, %v2037_v55  ;;  %v2077_v59 = vsel %vm2075_vm8, %v2076_v54, %v2074_v56 }
 0x6d9   :  { %2095 = vrot.lane.b32.xlu1 %v2077_v59, %s5084_s26  ;;  %v2079_v7 = vmul.f32 %v4990_v13, %v2069_v41 }
 0x6da   :  { %v2055_v61 = vsub.f32 %v2043_v57, %v2049_v60  ;;  %v5968_v60 = vld [vmem:[%s6280_s2 + $0x68] ss:$0 sm:$0xff] }
 0x6db   :  { %v2081_v63 = vsel %vm2080_vm9, %v2069_v41, %v2079_v7  ;;  %v2045_v36 = vpop.permute.xlu0 %2044 }
 0x6dc   :  { %v4992_v46 = vpop.eup %4991  ;;  %v2058_v19 = vmul.f32 0.5, %v2055_v61  ;;  %v2084_v20 = vsel %vm2082_vm10, %v2083_v16, %v2081_v63  ;;  %v2053_v11 = vsub.f32 %v2041_v14, %v2045_v36  ;;  %v1998_v36 = vand.u32 2147483648, %v5824_v58 }
 0x6dd   :  { %2097 = vrot.lane.b32.xlu1 %v2084_v20, %s5084_s26  ;;  %v2086_v30 = vmul.f32 %v4992_v46, %v2070_v4 }
 0x6de   :  { %2121 = vrot.lane.b32.xlu0 %v2058_v19, %s5087_s24  ;;  %v2056_v23 = vmul.f32 0.5, %v2053_v11 }
 0x6df   :  { %v2088_v1 = vsel %vm2087_vm11, %v2070_v4, %v2086_v30  ;;  %v2035_v22 = vpop.permute.xlu0 %2034  ;;  %v1979_v4 = vpop.f32.mrb[44].mxu0 }
 0x6e0   :  { %v2091_v32 = vsel %vm2089_vm14, %v2090_v31, %v2088_v1  ;;  %v2042_v3 = vsub.f32 %v5828_v9, %v2035_v22  ;;  %v4463_v53 = vpop.f32.mrb[45].mxu0 }
 0x6e1   :  { %2099 = vrot.lane.b32.xlu1 %v2091_v32, %s5084_s26  ;;  %v1984_v13 = vpop.f32.mrb[46].mxu0  ;;  %v2703_v53 = vld [vmem:[%s6280_s2 + $0x50] sm:$0xff] }
 0x6e2   :  { %v4466_v57 = vpop.f32.mrb[47].mxu0 }
 0x6e3   :  { %v1989_v61 = vpop.f32.mrb[48].mxu0 }
 0x6e4   :  { %v4469_v16 = vpop.f32.mrb[49].mxu0 }
 0x6e5   :  { %2046 = vrot.lane.b32.xlu1 %v5828_v9, %s5086_s5 }
 0x74b   :  { %v2096_v27 = vpop.permute.xlu1 %2095 }
 0x74c   :  { %4993 = vrcp.f32 %v2096_v27 }
 0x74f   :  { %v2098_v62 = vpop.permute.xlu1 %2097 }
 0x750   :  { %4995 = vrcp.f32 %v2098_v62  ;;  %v2122_v17 = vpop.permute.xlu0 %2121  ;;  %v2310_v62 = vld [vmem:[%s6280_s2 + $0x90] sm:$0x3f] }
 0x751   :  { %4481 = vmatmul.mubr.msk.f32.vlgmr.msra.gmra.mrb[52].mxu1 %vm770_vm12, %v2122_v17 }
 0x752   :  { %4888 = vmatpush3.bf16.msk.msra.mxu1 %vm5488_vm7, %v4886_v6  ;;  %4487 = vmatprep.mubr.msk.f32.mxu1 %vm5081_vm1, %v5082_v25  ;;  %vm1995_vm7 = vcmp.eq.f32.partialorder %v5824_v58, inf  ;;  %v2005_v6 = vand.u32 2147483648, %v5828_v9 }
 0x753   :  { %v2100_v26 = vpop.permute.xlu1 %2099  ;;  %4496 = vmatprep.subr.mxu1 %v5082_v25 }
 0x754   :  { %4997 = vrcp.f32 %v2100_v26  ;;  %v2012_v26 = vand.u32 2147483648, %v5832_v38 }
 0x755   :  { %4999 = vrcp.f32 %v1890_v0 }
 0x756   :  { %v4994_v37 = vpop.eup %4993  ;;  %5001 = vrcp.f32 %v1895_v15 }
 0x757   :  { %v2047_v39 = vpop.permute.xlu1 %2046  ;;  %v2105_v5 = vmul.f32 %v4994_v37, %v2056_v23  ;;  %5003 = vrcp.f32 %v1900_v42 }
 0x758   :  { %v2054_v44 = vsub.f32 %v2042_v3, %v2047_v39  ;;  %5005 = vrsqrt.f32 %v5824_v58 }
 0x759   :  { %2215 = vrot.lane.b32.xlu1 %v2105_v5, %s5087_s24  ;;  %5007 = vrsqrt.f32 %v5828_v9 }
 0x75a   :  { %v4996_v18 = vpop.eup %4995  ;;  %v2057_v21 = vmul.f32 0.5, %v2054_v44  ;;  %5009 = vrsqrt.f32 %v5832_v38  ;;  %v2502_v44 = vld [vmem:[%s6280_s2 + $0xa0] sm:$0x3f] }
 0x75c   :  { %v2107_v41 = vmul.f32 %v4996_v18, %v2057_v21  ;;  %v2598_v18 = vld [vmem:[%s6280_s2 + $0xa8] sm:$0x3f] }
 0x75d   :  { %2117 = vrot.lane.b32.xlu1 %v2056_v23, %s5087_s24  ;;  %v2406_v23 = vld [vmem:[%s6280_s2 + $0x98] sm:$0x3f] }
 0x75e   :  { %v4998_v50 = vpop.eup %4997  ;;  %2217 = vrot.lane.b32.xlu0 %v2107_v41, %s5087_s24  ;;  %v6048_v41 = vld [vmem:[%s6280_s2 + $0xd8] ss:$0 sm:$0xff] }
 0x75f   :  { %v5000_v54 = vpop.eup %4999  ;;  %v2109_v55 = vmul.f32 %v4998_v50, %v2058_v19  ;;  %v5978_v19 = vadd.f32 %v5736_v10, %v5741_v29 }
 0x760   :  { %v5961_v56 = vmul.f32 %v5000_v54, %v1979_v4  ;;  %v5002_v59 = vpop.eup %5001  ;;  %v2704_v54 = vld [vmem:[%s6280_s2 + $0x58] sm:$0xff] }
 0x761   :  { %2119 = vrot.lane.b32.xlu1 %v2057_v21, %s5087_s24  ;;  %v5970_v7 = vmul.f32 %v5002_v59, %v1984_v13  ;;  %v5004_v63 = vpop.eup %5003  ;;  %v2711_v20 = vadd.f32 %v5968_v60, %v5978_v19 }
 0x762   :  { %2219 = vrot.lane.b32.xlu0 %v2109_v55, %s5087_s24  ;;  %v5974_v46 = vmul.f32 %v5004_v63, %v1989_v61  ;;  %v5006_v31 = vpop.eup %5005  ;;  %v3629_v42 = vadd.f32 -1.0, %v5961_v56  ;;  %v2705_v56 = vld [vmem:[%s6280_s2 + $0x60] sm:$0x3f] }
 0x763   :  { %v3658_v30 = vmul.f32 -1.442695, %v2711_v20  ;;  %v1994_v1 = vmul.f32 %v5006_v31, %v5824_v58  ;;  %v5008_v32 = vpop.eup %5007  ;;  %v4893_v13 = vpack.c.bf16 %v2705_v56, %v2704_v54 }
 0x764   :  { %v2001_v29 = vmul.f32 %v5008_v32, %v5828_v9  ;;  %v5010_v35 = vpop.eup %5009  ;;  %v3631_v43 = vadd.f32 -1.0, %v5974_v46 }
 0x765   :  { %5011 = vpow2.f32 %v3658_v30  ;;  %v1996_v10 = vsel %vm1995_vm7, %v5824_v58, %v1994_v1  ;;  %v2008_v22 = vmul.f32 %v5010_v35, %v5832_v38  ;;  %2966 = vrot.lane.b32.xlu1 %v6048_v41, %s5088_s23 }
 0x766   :  { %2719 = vrot.lane.b32.xlu0 %v5968_v60, %s5088_s23  ;;  %v1999_v27 = vsel %vm1997_vm15, %v1998_v36, %v1996_v10  ;;  %v2003_v52 = vsel %vm2002_vm2, %v5828_v9, %v2001_v29 }
 0x767   :  { %5013 = vrcp.f32 %v1999_v27  ;;  %v2006_v17 = vsel %vm2004_vm4, %v2005_v6, %v2003_v52  ;;  %v2010_v11 = vsel %vm2009_vm5, %v5832_v38, %v2008_v22 }
 0x768   :  { %5015 = vrcp.f32 %v2006_v17  ;;  %v2013_v9 = vsel %vm2011_vm0, %v2012_v26, %v2010_v11 }
 0x76f   :  { %v5012_v47 = vpop.eup %5011 }
 0x770   :  { %v2715_v14 = vadd.f32 1.0, %v5012_v47 }
 0x771   :  { %v5014_v38 = vpop.eup %5013 }
 0x772   :  { %5017 = vrcp.f32 %v2715_v14  ;;  %v2015_v39 = vmul.f32 %v5014_v38, %v5537_v45  ;;  %v5016_v5 = vpop.eup %5015 }
 0x773   :  { %5019 = vrcp.f32 %v2013_v9  ;;  %v2017_v45 = vmul.f32 %v5016_v5, %v5539_v48 }
 0x77c   :  { %v6029_v12 = vpop.eup %5017 }
 0x77d   :  { %v5020_v40 = vpop.eup %5019 }
 0x77e   :  { %v2019_v48 = vmul.f32 %v5020_v40, %v5547_v51  ;;  %v3630_v51 = vadd.f32 -1.0, %v5970_v7 }
 0x7cb   :  { %v2216_v58 = vpop.permute.xlu1 %2215 }
 0x7cc   :  { %4488 = vmatmul.mubr.msk.f32.vlgmr.msra.gmra.mrb[54].mxu1 %vm770_vm12, %v2216_v58 }
 0x7cd   :  { %4497 = vmatpush3.msk.msra.mxu1 %vm950_vm13, %v2310_v62  ;;  %4490 = vmatprep.mubr.msk.f32.mxu1 %vm5081_vm1, %v5082_v25 }
 0x7ce   :  { %4518 = vmatprep.subr.mxu1 %v5082_v25 }
 0x7cf   :  { %v2118_v0 = vpop.permute.xlu1 %2117 }
 0x7d0   :  { %4475 = vmatmul.mubr.msk.f32.vlgmr.msra.gmra.mrb[50].mxu0 %vm770_vm12, %v2118_v0  ;;  %v2218_v34 = vpop.permute.xlu0 %2217 }
 0x7d1   :  { %4491 = vmatmul.mubr.msk.f32.gmra.mrb[56].mxu1 %vm770_vm12, %v2218_v34  ;;  %4477 = vmatprep.mubr.msk.f32.mxu0 %vm5081_vm1, %v5082_v25 }
 0x7d2   :  { %4493 = vmatprep.mubr.msk.f32.mxu1 %vm5081_vm1, %v5082_v25  ;;  %4508 = vmatpush3.msk.msra.mxu0 %vm950_vm13, %v2406_v23 }
 0x7d3   :  { %v2120_v37 = vpop.permute.xlu1 %2119  ;;  %4529 = vmatprep.subr.mxu0 %v5082_v25 }
 0x7d4   :  { %4478 = vmatmul.mubr.msk.f32.gmra.mrb[52].mxu0 %vm770_vm12, %v2120_v37  ;;  %v2220_v3 = vpop.permute.xlu0 %2219 }
 0x7d5   :  { %4494 = vmatmul.mubr.msk.f32.gmra.mrb[58].mxu1 %vm770_vm12, %v2220_v3  ;;  %4509 = vmatprep.mubr.msk.f32.mxu0 %vm5081_vm1, %v5082_v25  ;;  %vm6107_vm12 = vmpackc.low %vm950_vm13, %vm5083_vm3  ;;  %vm2740_vm3 = vcmask 244736  }
 0x7d6   :  { %4498 = vmatprep.mubr.msk.f32.mxu1 %vm5081_vm1, %v5082_v25 }
 0x7d8   :  { %4510 = vmatmul.mubr.msk.f32.vlgmr.msra.gmra.mrb[54].mxu0 %vm943_vm6, %v2015_v39  ;;  %v2720_v15 = vpop.permute.xlu0 %2719 }
 0x7d9   :  { %v2722_v21 = vmul.f32 %v6029_v12, %v2720_v15  ;;  %4499 = vmatmul.mubr.msk.f32.vlgmr.msra.gmra.mrb[60].mxu1 %vm943_vm6, %v1999_v27  ;;  %4512 = vmatprep.mubr.msk.f32.mxu0 %vm5081_vm1, %v5082_v25  ;;  %v3656_v15 = vld [vmem:[%s6280_s2 + $0xb0] ss:$0 sm:$0xff] }
 0x7da   :  { %4519 = vmatpush3.msk.msra.mxu1 %vm950_vm13, %v2502_v44  ;;  %4501 = vmatprep.mubr.msk.f32.mxu1 %vm5081_vm1, %v5082_v25 }
 0x7db   :  { %2724 = vrot.lane.b32.xlu0 %v2722_v21, %s5089_s7  ;;  %4530 = vmatpush3.msk.msra.mxu0 %vm950_vm13, %v2598_v18  ;;  %vm3546_vm13 = vcmask 3072  }
 0x7dc   :  { %4513 = vmatmul.mubr.msk.f32.gmra.mrb[56].mxu0 %vm943_vm6, %v2017_v45  ;;  %4889 = vmatprep.subr.bf16.mxu1 %v5080_v24 }
 0x7dd   :  { %4502 = vmatmul.mubr.msk.f32.gmra.mrb[62].mxu1 %vm943_vm6, %v2006_v17  ;;  %4515 = vmatprep.mubr.msk.f32.mxu0 %vm5081_vm1, %v5082_v25 }
 0x7de   :  { %4504 = vmatprep.mubr.msk.f32.mxu1 %vm5081_vm1, %v5082_v25  ;;  %4896 = vmatprep.subr.bf16.mxu0 %v5080_v24 }
 0x7e0   :  { %4516 = vmatmul.mubr.msk.f32.gmra.mrb[58].mxu0 %vm943_vm6, %v2019_v48 }
 0x7e1   :  { %4505 = vmatmul.mubr.msk.f32.gmra.mrb[64].mxu1 %vm943_vm6, %v2013_v9  ;;  %4531 = vmatprep.mubr.msk.f32.mxu0 %vm5081_vm1, %v5082_v25 }
 0x7e2   :  { %4520 = vmatprep.mubr.msk.f32.mxu1 %vm5081_vm1, %v5082_v25 }
 0x7e4   :  { %4532 = vmatmul.mubr.msk.f32.vlgmr.msra.gmra.mrb[60].mxu0 %vm943_vm6, %v5938_v33 }
 0x7e5   :  { %4521 = vmatmul.mubr.msk.f32.vlgmr.msra.gmra.mrb[66].mxu1 %vm943_vm6, %v3629_v42  ;;  %4534 = vmatprep.mubr.msk.f32.mxu0 %vm5081_vm1, %v5082_v25 }
 0x7e6   :  { %4523 = vmatprep.mubr.msk.f32.mxu1 %vm5081_vm1, %v5082_v25 }
 0x7e8   :  { %4535 = vmatmul.mubr.msk.f32.gmra.mrb[62].mxu0 %vm943_vm6, %v5954_v8 }
 0x7e9   :  { %4524 = vmatmul.mubr.msk.f32.gmra.mrb[68].mxu1 %vm943_vm6, %v3630_v51  ;;  %4537 = vmatprep.mubr.msk.f32.mxu0 %vm5081_vm1, %v5082_v25 }
 0x7ea   :  { %4526 = vmatprep.mubr.msk.f32.mxu1 %vm5081_vm1, %v5082_v25 }
 0x7ec   :  { %4538 = vmatmul.mubr.msk.f32.gmra.mrb[64].mxu0 %vm943_vm6, %v5957_v2  ;;  %v2702_v2 = vld [vmem:[%s6280_s2 + $0x48] sm:$0xff] }
 0x7ed   :  { %4527 = vmatmul.mubr.msk.f32.gmra.mrb[70].mxu1 %vm943_vm6, %v3631_v43  ;;  %4559 = vmatprep.mubr.msk.f32.mxu0 %vm5081_vm1, %v5082_v25  ;;  %v4890_v55 = vpack.c.bf16 %v2703_v53, %v2702_v2 }
 0x7ee   :  { %4548 = vmatprep.mubr.msk.f32.mxu1 %vm5081_vm1, %v5082_v25 }
 0x7ef   :  { %4891 = vmatpush3.bf16.msra.mxu1 %v4890_v55  ;;  %4898 = vmatpush3.bf16.msra.mxu0 %v4890_v55 }
 0x7f0   :  { %4892 = vmatprep.subr.bf16.mxu1 %v5080_v24  ;;  %4899 = vmatprep.subr.bf16.mxu0 %v5080_v24 }
 0x7f3   :  { %4895 = vmatpush3.bf16.msk.msra.mxu1 %vm6107_vm12, %v4893_v13  ;;  %4902 = vmatpush3.bf16.msk.msra.mxu0 %vm6107_vm12, %v4893_v13  ;;  %v2729_v13 = vsub.f32 1.0, %v6029_v12 }
 0x7f4   :  { %4903 = vmatprep.subr.bf16.mxu1 %v5080_v24  ;;  %4910 = vmatprep.subr.bf16.mxu0 %v5080_v24 }
 0x824   :  { %v2208_v33 = vpop.f32.mrb[52].mxu1 }
 0x825   :  { %v4482_v8 = vpop.f32.mrb[53].mxu1 }
 0x84d   :  { %v2725_v4 = vpop.permute.xlu0 %2724 }
 0x84e   :  { %v2727_v49 = vadd.f32 %v2725_v4, %v5978_v19 }
 0x850   :  { %5021 = vtanh.f32 %v2727_v49 }
 0x85a   :  { %v5022_v50 = vpop.eup %5021 }
 0x85b   :  { %2731 = vrot.lane.b32.xlu0 %v5022_v50, %s5090_s10 }
 0x89f   :  { %v2296_v59 = vpop.f32.mrb[54].mxu1 }
 0x8a0   :  { %v4489_v7 = vpop.f32.mrb[55].mxu1 }
 0x8a3   :  { %v2198_v61 = vpop.f32.mrb[50].mxu0 }
 0x8a4   :  { %v2297_v16 = vadd.f32 %v2296_v59, %v2198_v61  ;;  %v4476_v63 = vpop.f32.mrb[51].mxu0  ;;  %v2301_v46 = vpop.f32.mrb[56].mxu1 }
 0x8a5   :  { %v4492_v20 = vpop.f32.mrb[57].mxu1 }
 0x8a6   :  { %v2967_v20 = vpop.permute.xlu1 %2966 }
 0x8a7   :  { %v2203_v30 = vpop.f32.mrb[52].mxu0 }
 0x8a8   :  { %v2302_v31 = vadd.f32 %v2301_v46, %v2203_v30  ;;  %v4479_v1 = vpop.f32.mrb[53].mxu0  ;;  %v2306_v32 = vpop.f32.mrb[58].mxu1 }
 0x8a9   :  { %v2307_v10 = vadd.f32 %v2306_v32, %v2208_v33  ;;  %v4495_v29 = vpop.f32.mrb[59].mxu1 }
 0x8aa   :  { %v2949_v29 = vld [vmem:[%s6280_s2 + $0xb8] sm:$0xff] }
 0x8ab   :  { %v2485_v35 = vpop.f32.mrb[54].mxu0 }
 0x8ac   :  { %v2389_v36 = vpop.f32.mrb[60].mxu1  ;;  %v4511_v27 = vpop.f32.mrb[55].mxu0 }
 0x8ad   :  { %v2403_v47 = vadd.f32 %v2389_v36, %v2297_v16  ;;  %v4500_v52 = vpop.f32.mrb[61].mxu1  ;;  %v2735_v16 = vmul.f32 0.0, %v6029_v12  ;;  %v2951_v36 = vld [vmem:[%s6280_s2 + $0xc8] sm:$0xff] }
 0x8af   :  { %v2490_v22 = vpop.f32.mrb[56].mxu0  ;;  %v2499_v6 = vadd.f32 %v2485_v35, %v2403_v47  ;;  %v2950_v35 = vld [vmem:[%s6280_s2 + $0xc0] sm:$0xff]  ;;  %v2952_v47 = vld [vmem:[%s6280_s2 + $0xd0] sm:$0x3f] }
 0x8b0   :  { %v2394_v14 = vpop.f32.mrb[62].mxu1  ;;  %v4514_v62 = vpop.f32.mrb[57].mxu0  ;;  %v6151_v27 = vpack.c.bf16 %v2950_v35, %v2949_v29  ;;  %v6157_v52 = vpack.c.bf16 %v2952_v47, %v2951_v36 }
 0x8b1   :  { %v2404_v17 = vadd.f32 %v2394_v14, %v2302_v31  ;;  %v4503_v58 = vpop.f32.mrb[63].mxu1 }
 0x8b3   :  { %v2495_v11 = vpop.f32.mrb[58].mxu0  ;;  %v2500_v26 = vadd.f32 %v2490_v22, %v2404_v17 }
 0x8b4   :  { %v2399_v9 = vpop.f32.mrb[64].mxu1  ;;  %v4517_v0 = vpop.f32.mrb[59].mxu0 }
 0x8b5   :  { %v2405_v23 = vadd.f32 %v2399_v9, %v2307_v10  ;;  %v4506_v34 = vpop.f32.mrb[65].mxu1 }
 0x8b7   :  { %v2677_v38 = vpop.f32.mrb[60].mxu0  ;;  %v2501_v37 = vadd.f32 %v2495_v11, %v2405_v23 }
 0x8b8   :  { %v2581_v3 = vpop.f32.mrb[66].mxu1  ;;  %v4533_v39 = vpop.f32.mrb[61].mxu0 }
 0x8b9   :  { %v2595_v5 = vadd.f32 %v2581_v3, %v2499_v6  ;;  %v4522_v44 = vpop.f32.mrb[67].mxu1 }
 0x8bb   :  { %v2691_v18 = vadd.f32 %v2677_v38, %v2595_v5  ;;  %v2682_v21 = vpop.f32.mrb[62].mxu0 }
 0x8bc   :  { %v2586_v45 = vpop.f32.mrb[68].mxu1  ;;  %v4536_v40 = vpop.f32.mrb[63].mxu0 }
 0x8bd   :  { %v6122_v48 = vadd.f32 %v3656_v15, %v2691_v18  ;;  %v2596_v42 = vadd.f32 %v2586_v45, %v2500_v26  ;;  %v4525_v51 = vpop.f32.mrb[69].mxu1 }
 0x8bf   :  { %v2958_v43 = vadd.f32 %v6048_v41, %v6122_v48  ;;  %v2692_v33 = vadd.f32 %v2682_v21, %v2596_v42  ;;  %v2687_v8 = vpop.f32.mrb[64].mxu0 }
 0x8c0   :  { %v2591_v4 = vpop.f32.mrb[70].mxu1  ;;  %v4539_v49 = vpop.f32.mrb[65].mxu0 }
 0x8c1   :  { %v3666_v50 = vmul.f32 -1.442695, %v2958_v43  ;;  %v6126_v2 = vadd.f32 %v3656_v15, %v2692_v33  ;;  %v2597_v53 = vadd.f32 %v2591_v4, %v2501_v37  ;;  %v4528_v54 = vpop.f32.mrb[71].mxu1 }
 0x8c3   :  { %5023 = vpow2.f32 %v3666_v50  ;;  %v2693_v55 = vadd.f32 %v2687_v8, %v2597_v53 }
 0x8c5   :  { %v6128_v56 = vadd.f32 %v3656_v15, %v2693_v55 }
 0x8cd   :  { %v5024_v59 = vpop.eup %5023  ;;  %v2732_v7 = vpop.permute.xlu0 %2731 }
 0x8ce   :  { %v2962_v61 = vadd.f32 1.0, %v5024_v59  ;;  %v2734_v63 = vmul.f32 %v2732_v7, %v2729_v13 }
 0x8d0   :  { %5025 = vrcp.f32 %v2962_v61  ;;  %v6132_v46 = vadd.f32 %v2735_v16, %v2734_v63 }
 0x8d2   :  { %2738 = vrot.lane.b32.xlu0 %v6132_v46, %s5090_s10  ;;  %v2842_v8 = vrot.slane %v6132_v46, 4 }
 0x8da   :  { %v5026_v30 = vpop.eup %5025 }
 0x8db   :  { %v2969_v31 = vmul.f32 %v5026_v30, %v2967_v20  ;;  %v2976_v22 = vsub.f32 1.0, %v5026_v30  ;;  %v2982_v14 = vmul.f32 0.0, %v5026_v30 }
 0x8dd   :  { %2971 = vrot.lane.b32.xlu1 %v2969_v31, %s5089_s7 }
 0x944   :  { %v2739_v1 = vpop.permute.xlu0 %2738 }
 0x945   :  { %4549 = vmatmul.mubr.msk.f32.vlgmr.msra.gmra.mrb[72].mxu1 %vm2740_vm3, %v2739_v1 }
 0x946   :  { %4570 = vmatprep.mubr.msk.f32.mxu1 %vm5081_vm1, %v5082_v25  ;;  %4905 = vmatpush3.bf16.msra.mxu1 %v6151_v27 }
 0x947   :  { %4906 = vmatprep.subr.bf16.mxu1 %v5080_v24 }
 0x94a   :  { %4909 = vmatpush3.bf16.msk.msra.mxu1 %vm6107_vm12, %v6157_v52 }
 0x94b   :  { %4917 = vmatprep.subr.bf16.mxu1 %v5080_v24 }
 0x94f   :  { %v2972_v12 = vpop.permute.xlu1 %2971 }
 0x950   :  { %v2974_v32 = vadd.f32 %v2972_v12, %v6122_v48 }
 0x952   :  { %5027 = vtanh.f32 %v2974_v32 }
 0x95c   :  { %v5028_v10 = vpop.eup %5027 }
 0x95d   :  { %2978 = vrot.lane.b32.xlu1 %v5028_v10, %s5090_s10 }
 0x9cf   :  { %v2979_v6 = vpop.permute.xlu1 %2978 }
 0x9d0   :  { %v2981_v62 = vmul.f32 %v2979_v6, %v2976_v22 }
 0x9d2   :  { %v6164_v17 = vadd.f32 %v2982_v14, %v2981_v62 }
 0x9d4   :  { %2985 = vrot.lane.b32.xlu1 %v6164_v17, %s5090_s10  ;;  %v3088_v20 = vrot.slane %v6164_v17, 4 }
 0xa18   :  { %v2812_v58 = vpop.f32.mrb[72].mxu1 }
 0xa19   :  { %v2813_v11 = vadd.f32 %v5968_v60, %v2812_v58  ;;  %v4550_v26 = vpop.f32.mrb[73].mxu1 }
 0xa1b   :  { %v2817_v9 = vrot.slane %v2813_v11, 4 }
 0xa1d   :  { %2826 = vrot.lane.b32.xlu0 %v2817_v9, %s5088_s23  ;;  %v2819_v23 = vadd.f32 %v2817_v9, %v5978_v19 }
 0xa1f   :  { %v3661_v34 = vmul.f32 -1.442695, %v2819_v23 }
 0xa21   :  { %5029 = vpow2.f32 %v3661_v34 }
 0xa2b   :  { %v5030_v38 = vpop.eup %5029 }
 0xa2c   :  { %v2823_v37 = vadd.f32 1.0, %v5030_v38 }
 0xa2e   :  { %5031 = vrcp.f32 %v2823_v37 }
 0xa38   :  { %v5032_v3 = vpop.eup %5031 }
 0xa39   :  { %v2844_v53 = vmul.f32 %v5032_v3, %v2842_v8 }
 0xa46   :  { %v2986_v0 = vpop.permute.xlu1 %2985 }
 0xa47   :  { %4571 = vmatmul.mubr.msk.f32.vlgmr.msra.gmra.mrb[74].mxu1 %vm2740_vm3, %v2986_v0 }
 0xa48   :  { %4919 = vmatpush3.bf16.msra.mxu1 %v6151_v27  ;;  %4592 = vmatprep.mubr.msk.f32.mxu1 %vm5081_vm1, %v5082_v25 }
 0xa49   :  { %4920 = vmatprep.subr.bf16.mxu1 %v5080_v24 }
 0xa4c   :  { %4923 = vmatpush3.bf16.msk.msra.mxu1 %vm6107_vm12, %v6157_v52 }
 0xa4d   :  { %4931 = vmatprep.subr.bf16.mxu1 %v5080_v24 }
 0xa8f   :  { %v2827_v39 = vpop.permute.xlu0 %2826 }
 0xa90   :  { %v2829_v5 = vmul.f32 %v5032_v3, %v2827_v39 }
 0xa92   :  { %2831 = vrot.lane.b32.xlu0 %v2829_v5, %s5089_s7 }
 0xb04   :  { %v2832_v44 = vpop.permute.xlu0 %2831 }
 0xb05   :  { %v2834_v15 = vadd.f32 %v2832_v44, %v5978_v19  ;;  %v2836_v19 = vsub.f32 1.0, %v5032_v3 }
 0xb07   :  { %5033 = vtanh.f32 %v2834_v15 }
 0xb11   :  { %v5034_v18 = vpop.eup %5033 }
 0xb12   :  { %2838 = vrot.lane.b32.xlu0 %v5034_v18, %s5090_s10 }
 0xb1a   :  { %v3058_v21 = vpop.f32.mrb[74].mxu1 }
 0xb1b   :  { %v3059_v45 = vadd.f32 %v6048_v41, %v3058_v21  ;;  %v4572_v40 = vpop.f32.mrb[75].mxu1 }
 0xb1d   :  { %v3063_v42 = vrot.slane %v3059_v45, 4 }
 0xb1f   :  { %3072 = vrot.lane.b32.xlu1 %v3063_v42, %s5088_s23  ;;  %v3065_v51 = vadd.f32 %v3063_v42, %v6122_v48 }
 0xb21   :  { %v3669_v43 = vmul.f32 -1.442695, %v3065_v51 }
 0xb23   :  { %5035 = vpow2.f32 %v3669_v43 }
 0xb2d   :  { %v5036_v33 = vpop.eup %5035 }
 0xb2e   :  { %v3069_v4 = vadd.f32 1.0, %v5036_v33 }
 0xb30   :  { %5037 = vrcp.f32 %v3069_v4 }
 0xb3a   :  { %v5038_v13 = vpop.eup %5037 }
 0xb3b   :  { %v3082_v30 = vsub.f32 1.0, %v5038_v13  ;;  %v3090_v1 = vmul.f32 %v5038_v13, %v3088_v20 }
 0xb84   :  { %v2839_v49 = vpop.permute.xlu0 %2838 }
 0xb85   :  { %v2841_v50 = vmul.f32 %v2839_v49, %v2836_v19 }
 0xb87   :  { %v6187_v54 = vadd.f32 %v2844_v53, %v2841_v50 }
 0xb89   :  { %v2847_v55 = vrot.slane %v6187_v54, 4  ;;  %v3684_v54 = vld [vmem:[%s6280_s2 + $0xe2] ss:$0 sm:$0xff] }
 0xb8b   :  { %2848 = vrot.lane.b32.xlu0 %v2847_v55, %s5090_s10 }
 0xb91   :  { %v3073_v59 = vpop.permute.xlu1 %3072 }
 0xb92   :  { %v3075_v7 = vmul.f32 %v5038_v13, %v3073_v59 }
 0xb94   :  { %3077 = vrot.lane.b32.xlu1 %v3075_v7, %s5089_s7 }
 0xbfd   :  { %v2849_v61 = vpop.permute.xlu0 %2848 }
 0xbfe   :  { %4560 = vmatmul.mubr.msk.f32.vlgmr.msra.gmra.mrb[66].mxu0 %vm2740_vm3, %v2849_v61 }
 0xbff   :  { %4912 = vmatpush3.bf16.msra.mxu0 %v6151_v27  ;;  %4581 = vmatprep.mubr.msk.f32.mxu0 %vm5081_vm1, %v5082_v25 }
 0xc00   :  { %4913 = vmatprep.subr.bf16.mxu0 %v5080_v24 }
 0xc03   :  { %4916 = vmatpush3.bf16.msk.msra.mxu0 %vm6107_vm12, %v6157_v52 }
 0xc04   :  { %4924 = vmatprep.subr.bf16.mxu0 %v5080_v24 }
 0xc06   :  { %v3078_v16 = vpop.permute.xlu1 %3077 }
 0xc07   :  { %v3080_v63 = vadd.f32 %v3078_v16, %v6122_v48 }
 0xc09   :  { %5039 = vtanh.f32 %v3080_v63 }
 0xc13   :  { %v5040_v46 = vpop.eup %5039 }
 0xc14   :  { %3084 = vrot.lane.b32.xlu1 %v5040_v46, %s5090_s10 }
 0xc86   :  { %v3085_v31 = vpop.permute.xlu1 %3084 }
 0xc87   :  { %v3087_v12 = vmul.f32 %v3085_v31, %v3082_v30 }
 0xc89   :  { %v3091_v32 = vadd.f32 %v3090_v1, %v3087_v12 }
 0xc8b   :  { %v3093_v10 = vrot.slane %v3091_v32, 4 }
 0xc8d   :  { %3094 = vrot.lane.b32.xlu1 %v3093_v10, %s5090_s10 }
 0xcd1   :  { %v6207_v29 = vpop.f32.mrb[66].mxu0 }
 0xcd2   :  { %v4561_v35 = vpop.f32.mrb[67].mxu0 }
 0xcff   :  { %v3095_v36 = vpop.permute.xlu1 %3094 }
 0xd00   :  { %4582 = vmatmul.mubr.msk.f32.vlgmr.msra.gmra.mrb[68].mxu0 %vm2740_vm3, %v3095_v36 }
 0xd01   :  { %4926 = vmatpush3.bf16.msra.mxu0 %v6151_v27  ;;  %4603 = vmatprep.mubr.msk.f32.mxu0 %vm5081_vm1, %v5082_v25 }
 0xd02   :  { %4927 = vmatprep.subr.bf16.mxu0 %v5080_v24 }
 0xd05   :  { %4930 = vmatpush3.bf16.msk.msra.mxu0 %vm6107_vm12, %v6157_v52 }
 0xdd3   :  { %v3164_v48 = vpop.f32.mrb[68].mxu0 }
 0xdd4   :  { %v3165_v47 = vadd.f32 %v6048_v41, %v3164_v48  ;;  %v4583_v22 = vpop.f32.mrb[69].mxu0 }
 0xdd5   :  { %v2919_v22 = vadd.f32 %v5968_v60, %v6207_v29 }
 0xdd6   :  { %3176 = vrot.lane.b32.xlu0 %v3165_v47, %s5088_s23  ;;  %v3168_v6 = vadd.f32 %v3165_v47, %v6126_v2 }
 0xdd8   :  { %v3672_v14 = vmul.f32 -1.442695, %v3168_v6  ;;  %v2922_v6 = vadd.f32 %v2919_v22, %v5739_v28 }
 0xdda   :  { %5041 = vpow2.f32 %v3672_v14  ;;  %v3664_v14 = vmul.f32 -1.442695, %v2922_v6 }
 0xde4   :  { %v5042_v62 = vpop.eup %5041 }
 0xde5   :  { %v3172_v17 = vadd.f32 1.0, %v5042_v62 }
 0xde7   :  { %5043 = vrcp.f32 %v3172_v17 }
 0xdf1   :  { %v5044_v58 = vpop.eup %5043 }
 0xdf2   :  { %v3186_v34 = vsub.f32 1.0, %v5044_v58  ;;  %v3193_v37 = vmul.f32 %v5044_v58, %v3093_v10 }
 0xe48   :  { %v3177_v11 = vpop.permute.xlu0 %3176 }
 0xe49   :  { %v3179_v26 = vmul.f32 %v5044_v58, %v3177_v11 }
 0xe4b   :  { %3181 = vrot.lane.b32.xlu1 %v3179_v26, %s5089_s7 }
 0xebd   :  { %v3182_v9 = vpop.permute.xlu1 %3181 }
 0xebe   :  { %v3184_v0 = vadd.f32 %v3182_v9, %v6126_v2 }
 0xec0   :  { %5045 = vtanh.f32 %v3184_v0 }
 0xeca   :  { %v5046_v23 = vpop.eup %5045 }
 0xecb   :  { %3188 = vrot.lane.b32.xlu0 %v5046_v23, %s5090_s10  ;;  %v3682_v23 = vld [vmem:[%s6280_s2 + $0xe0] ss:$0 sm:$0xff] }
 0xf3d   :  { %v3189_v38 = vpop.permute.xlu0 %3188 }
 0xf3e   :  { %v3191_v3 = vmul.f32 %v3189_v38, %v3186_v34 }
 0xf40   :  { %v3194_v39 = vadd.f32 %v3193_v37, %v3191_v3 }
 0xf42   :  { %3196 = vrot.lane.b32.xlu1 %v3194_v39, %s5090_s10  ;;  %v3296_v33 = vrot.slane %v3194_v39, 4 }
 0xfb4   :  { %v3197_v5 = vpop.permute.xlu1 %3196 }
 0xfb5   :  { %4593 = vmatmul.mubr.msk.f32.vlgmr.msra.gmra.mrb[76].mxu1 %vm2740_vm3, %v3197_v5 }
 0xfb6   :  { %4933 = vmatpush3.bf16.msra.mxu1 %v6151_v27  ;;  %4614 = vmatprep.mubr.msk.f32.mxu1 %vm5081_vm1, %v5082_v25  ;;  %vm3537_vm1 = vcmask 240640  }
 0xfb7   :  { %4934 = vmatprep.subr.bf16.mxu1 %v5080_v24 }
 0xfba   :  { %4937 = vmatpush3.bf16.msk.msra.mxu1 %vm6107_vm12, %v6157_v52 }
0x1088   :  { %v3266_v44 = vpop.f32.mrb[76].mxu1 }
0x1089   :  { %v3267_v15 = vadd.f32 %v6048_v41, %v3266_v44  ;;  %v4594_v18 = vpop.f32.mrb[77].mxu1 }
0x108b   :  { %v3271_v21 = vrot.slane %v3267_v15, 4 }
0x108d   :  { %3280 = vrot.lane.b32.xlu0 %v3271_v21, %s5088_s23  ;;  %v3273_v45 = vadd.f32 %v3271_v21, %v6126_v2 }
0x108f   :  { %v3675_v40 = vmul.f32 -1.442695, %v3273_v45 }
0x1091   :  { %5047 = vpow2.f32 %v3675_v40 }
0x109b   :  { %v5048_v27 = vpop.eup %5047 }
0x109c   :  { %v3277_v42 = vadd.f32 1.0, %v5048_v27  ;;  %v3683_v27 = vld [vmem:[%s6280_s2 + $0xe1] ss:$0 sm:$0xff] }
0x109e   :  { %5049 = vrcp.f32 %v3277_v42 }
0x10a8   :  { %v5050_v25 = vpop.eup %5049 }
0x10a9   :  { %v3290_v8 = vsub.f32 1.0, %v5050_v25  ;;  %v3298_v49 = vmul.f32 %v5050_v25, %v3296_v33 }
0x10ff   :  { %v3281_v24 = vpop.permute.xlu0 %3280 }
0x1100   :  { %v3283_v51 = vmul.f32 %v5050_v25, %v3281_v24 }
0x1102   :  { %3285 = vrot.lane.b32.xlu1 %v3283_v51, %s5089_s7 }
0x1174   :  { %v3286_v57 = vpop.permute.xlu1 %3285 }
0x1175   :  { %v3288_v52 = vadd.f32 %v3286_v57, %v6126_v2 }
0x1177   :  { %5051 = vtanh.f32 %v3288_v52 }
0x1181   :  { %v5052_v43 = vpop.eup %5051 }
0x1182   :  { %3292 = vrot.lane.b32.xlu0 %v5052_v43, %s5090_s10 }
0x11f4   :  { %v3293_v4 = vpop.permute.xlu0 %3292 }
0x11f5   :  { %v3295_v19 = vmul.f32 %v3293_v4, %v3290_v8 }
0x11f7   :  { %v3299_v50 = vadd.f32 %v3298_v49, %v3295_v19 }
0x11f9   :  { %v3301_v53 = vrot.slane %v3299_v50, 4 }
0x11fb   :  { %3302 = vrot.lane.b32.xlu1 %v3301_v53, %s5090_s10 }
0x126d   :  { %v3303_v13 = vpop.permute.xlu1 %3302 }
0x126e   :  { %4604 = vmatmul.mubr.msk.f32.vlgmr.msra.gmra.mrb[70].mxu0 %vm2740_vm3, %v3303_v13 }
0x1341   :  { %v3372_v59 = vpop.f32.mrb[70].mxu0 }
0x1342   :  { %v3373_v7 = vadd.f32 %v6048_v41, %v3372_v59  ;;  %v4605_v2 = vpop.f32.mrb[71].mxu0 }
0x1344   :  { %3384 = vrot.lane.b32.xlu0 %v3373_v7, %s5088_s23  ;;  %v3376_v61 = vadd.f32 %v3373_v7, %v6128_v56 }
0x1346   :  { %v3678_v16 = vmul.f32 -1.442695, %v3376_v61 }
0x1348   :  { %5053 = vpow2.f32 %v3678_v16 }
0x1352   :  { %v5054_v63 = vpop.eup %5053 }
0x1353   :  { %v3380_v46 = vadd.f32 1.0, %v5054_v63 }
0x1355   :  { %5055 = vrcp.f32 %v3380_v46 }
0x135f   :  { %v5056_v20 = vpop.eup %5055 }
0x1360   :  { %v3394_v10 = vsub.f32 1.0, %v5056_v20  ;;  %v3401_v36 = vmul.f32 %v5056_v20, %v3301_v53 }
0x13b6   :  { %v3385_v30 = vpop.permute.xlu0 %3384 }
0x13b7   :  { %v3387_v31 = vmul.f32 %v5056_v20, %v3385_v30 }
0x13b9   :  { %3389 = vrot.lane.b32.xlu1 %v3387_v31, %s5089_s7 }
0x142b   :  { %v3390_v1 = vpop.permute.xlu1 %3389 }
0x142c   :  { %v3392_v12 = vadd.f32 %v3390_v1, %v6128_v56 }
0x142e   :  { %5057 = vtanh.f32 %v3392_v12 }
0x142f   :  { %5059 = vpow2.f32 %v3664_v14 }
0x1438   :  { %v5058_v32 = vpop.eup %5057 }
0x1439   :  { %3396 = vrot.lane.b32.xlu0 %v5058_v32, %s5090_s10  ;;  %v5060_v62 = vpop.eup %5059 }
0x143a   :  { %v2926_v17 = vadd.f32 1.0, %v5060_v62 }
0x143c   :  { %5061 = vrcp.f32 %v2926_v17 }
0x1446   :  { %v5062_v11 = vpop.eup %5061 }
0x1447   :  { %v2940_v25 = vsub.f32 1.0, %v5062_v11  ;;  %v2947_v43 = vmul.f32 %v5062_v11, %v2847_v55 }
0x14ab   :  { %v3397_v35 = vpop.permute.xlu0 %3396 }
0x14ac   :  { %v3399_v48 = vmul.f32 %v3397_v35, %v3394_v10 }
0x14ae   :  { %v3402_v47 = vadd.f32 %v3401_v36, %v3399_v48 }
0x14b0   :  { %3404 = vrot.lane.b32.xlu1 %v3402_v47, %s5090_s10  ;;  %v3504_v24 = vrot.slane %v3402_v47, 4 }
0x14b4   :  { %2930 = vrot.lane.b32.xlu1 %v2919_v22, %s5088_s23 }
0x1522   :  { %v3405_v58 = vpop.permute.xlu1 %3404 }
0x1523   :  { %4615 = vmatmul.mubr.msk.f32.vlgmr.msra.gmra.mrb[78].mxu1 %vm2740_vm3, %v3405_v58 }
0x1526   :  { %v2931_v26 = vpop.permute.xlu1 %2930 }
0x1527   :  { %v2933_v9 = vmul.f32 %v5062_v11, %v2931_v26 }
0x1529   :  { %2935 = vrot.lane.b32.xlu1 %v2933_v9, %s5089_s7 }
0x159b   :  { %v2936_v0 = vpop.permute.xlu1 %2935 }
0x159c   :  { %v2938_v60 = vadd.f32 %v2936_v0, %v5739_v28 }
0x159e   :  { %5063 = vtanh.f32 %v2938_v60 }
0x15a8   :  { %v5064_v29 = vpop.eup %5063 }
0x15a9   :  { %2942 = vrot.lane.b32.xlu1 %v5064_v29, %s5090_s10 }
0x15ad   :  { %3516 = vrot.lane.b32.xlu1 %v3682_v23, %s5084_s26 }
0x15f6   :  { %v3474_v34 = vpop.f32.mrb[78].mxu1 }
0x15f7   :  { %v3475_v38 = vadd.f32 %v6048_v41, %v3474_v34  ;;  %v4616_v37 = vpop.f32.mrb[79].mxu1 }
0x15f9   :  { %v3479_v3 = vrot.slane %v3475_v38, 4 }
0x15fb   :  { %3488 = vrot.lane.b32.xlu0 %v3479_v3, %s5088_s23  ;;  %v3481_v39 = vadd.f32 %v3479_v3, %v6128_v56 }
0x15fd   :  { %v3681_v28 = vmul.f32 -1.442695, %v3481_v39 }
0x15ff   :  { %5065 = vpow2.f32 %v3681_v28 }
0x1609   :  { %v5066_v5 = vpop.eup %5065 }
0x160a   :  { %v3485_v44 = vadd.f32 1.0, %v5066_v5 }
0x160c   :  { %5067 = vrcp.f32 %v3485_v44 }
0x1616   :  { %v5068_v15 = vpop.eup %5067 }
0x1617   :  { %v3498_v57 = vsub.f32 1.0, %v5068_v15  ;;  %v3506_v33 = vmul.f32 %v5068_v15, %v3504_v24 }
0x161b   :  { %v2943_v42 = vpop.permute.xlu1 %2942 }
0x161c   :  { %v2945_v51 = vmul.f32 %v2943_v42, %v2940_v25 }
0x161e   :  { %v2948_v8 = vadd.f32 %v2947_v43, %v2945_v51 }
0x161f   :  { %v3517_v19 = vpop.permute.xlu1 %3516 }
0x1620   :  { %v3519_v53 = vmul.f32 %v3517_v19, %v2948_v8 }
0x166d   :  { %v3489_v18 = vpop.permute.xlu0 %3488 }
0x166e   :  { %v3491_v21 = vmul.f32 %v5068_v15, %v3489_v18 }
0x1670   :  { %3493 = vrot.lane.b32.xlu0 %v3491_v21, %s5089_s7 }
0x16e2   :  { %v3494_v45 = vpop.permute.xlu0 %3493 }
0x16e3   :  { %v3496_v40 = vadd.f32 %v3494_v45, %v6128_v56 }
0x16e5   :  { %5069 = vtanh.f32 %v3496_v40 }
0x16ef   :  { %v5070_v41 = vpop.eup %5069 }
0x16f0   :  { %3500 = vrot.lane.b32.xlu0 %v5070_v41, %s5090_s10 }
0x16f4   :  { %3525 = vrot.lane.b32.xlu0 %v3683_v27, %s5084_s26 }
0x1762   :  { %v3501_v52 = vpop.permute.xlu0 %3500 }
0x1763   :  { %v3503_v56 = vmul.f32 %v3501_v52, %v3498_v57 }
0x1765   :  { %v3507_v4 = vadd.f32 %v3506_v33, %v3503_v56 }
0x1766   :  { %v3526_v49 = vpop.permute.xlu0 %3525 }
0x1767   :  { %v3528_v50 = vmul.f32 %v3526_v49, %v3507_v4 }
0x1769   :  { %v3530_v13 = vrot.slane %v3528_v50, 4 }
0x176b   :  { %v3532_v59 = vadd.f32 %v3530_v13, %v3519_v53 }
0x176d   :  { %3534 = vrot.lane.b32.xlu0 %v3532_v59, %s5090_s10 }
0x17df   :  { %v3535_v7 = vpop.permute.xlu0 %3534 }
0x17e0   :  { %v3538_v2 = vsel %vm3537_vm1, %v3535_v7, 0.0 }
0x17e1   :  { %3539 = vadd.xlane.f32.xlu1 %v3538_v2 }
0x186e   :  { %v3540_v55 = vpop.xlane.xlu1 %3539 }
0x186f   :  { %v3545_v61 = vadd.f32 %v3684_v54, %v3540_v55 }
0x1871   :  { %3547 = vst.msk [vmem:[%s6281_s3] sm:$0xf] %vm3546_vm13, %v3545_v61 }

</bundles_post_ra>
